<compile_context>
chip_gen: v7x
topology: tpu7x:2x2x1
jax: 0.10.0
libtpu: 0.0.40
codegen_flags: <defaults>
</compile_context>

<pallas_src>
import jax
import jax.numpy as jnp
from jax.experimental import pallas as pl
from jax.experimental.pallas import tpu as pltpu

LATENT = 100
LATENT_PAD = 128          # 100 -> 128 (lane aligned)
IMG = 784
IMG_PAD = 896             # 784 -> 896 = 7 * 128 (lane aligned)
HID = 256


def _round_up(n, m):
    return ((n + m - 1) // m) * m


def _pad2d(a, rows, cols):
    r, c = a.shape
    return jnp.pad(a, ((0, rows - r), (0, cols - c)))


# --------------------------------------------------------------------------
# Kernel
# --------------------------------------------------------------------------
def gan_kernel(x_ref,
               gw1, gb1, gw2, gb2, gw3, gb3,
               dw1, db1, dw2, db2, dw3r, db3,
               out_ref):
    bf16 = jnp.bfloat16
    f32 = jnp.float32

    x = x_ref[...]                                                   # (TM, 128) bf16

    # ---------------- Generator ----------------
    h = jnp.dot(x, gw1[...], preferred_element_type=f32) + gb1[...]
    h = jnp.maximum(h, 0.0)                                          # ReLU (f32 on VPU)
    h = jnp.dot(h.astype(bf16), gw2[...], preferred_element_type=f32) + gb2[...]
    h = jnp.maximum(h, 0.0)                                          # ReLU
    h = jnp.dot(h.astype(bf16), gw3[...], preferred_element_type=f32) + gb3[...]
    g = jnp.tanh(h)                                                  # Tanh (f32 on EUP)
    # padded image columns are tanh(0 + 0) = 0, so they contribute nothing below

    # --------------- Discriminator --------------
    d = jnp.dot(g.astype(bf16), dw1[...], preferred_element_type=f32) + db1[...]
    d = jnp.where(d > 0, d, 0.2 * d)                                 # LeakyReLU(0.2)
    d = jnp.dot(d.astype(bf16), dw2[...], preferred_element_type=f32) + db2[...]
    d = jnp.where(d > 0, d, 0.2 * d)                                 # LeakyReLU(0.2)

    # Final 256 -> 1: VPU multiply + cross-lane reduce, no N=1 MXU pass.
    logit = jnp.sum(d * dw3r[...], axis=-1, keepdims=True) + db3[...]
    out_ref[...] = jax.nn.sigmoid(logit)                             # (TM, 1)


# --------------------------------------------------------------------------
# Parameters (torch.nn.Linear-style init) and bf16/padded packing
# --------------------------------------------------------------------------
def init_linear(key, fan_in, fan_out):
    kw, kb = jax.random.split(key)
    bound = 1.0 / jnp.sqrt(jnp.float32(fan_in))
    w = jax.random.uniform(kw, (fan_in, fan_out), jnp.float32, -bound, bound)
    b = jax.random.uniform(kb, (1, fan_out), jnp.float32, -bound, bound)
    return w, b


def make_params(key):
    keys = jax.random.split(key, 6)
    gw1, gb1 = init_linear(keys[0], LATENT, HID)   # 100 -> 256
    gw2, gb2 = init_linear(keys[1], HID, HID)      # 256 -> 256
    gw3, gb3 = init_linear(keys[2], HID, IMG)      # 256 -> 784
    dw1, db1 = init_linear(keys[3], IMG, HID)      # 784 -> 256
    dw2, db2 = init_linear(keys[4], HID, HID)      # 256 -> 256
    dw3, db3 = init_linear(keys[5], HID, 1)        # 256 -> 1
    return (gw1, gb1, gw2, gb2, gw3, gb3, dw1, db1, dw2, db2, dw3, db3)


def prepare_params(params):
    """Pad misaligned dims with zeros and cast matmul weights to bf16.

    Biases stay f32 (added to f32 accumulators on the VPU). The final layer's
    (256, 1) weight is transposed to a (1, 256) f32 row for the VPU reduction.
    """
    (gw1, gb1, gw2, gb2, gw3, gb3, dw1, db1, dw2, db2, dw3, db3) = params
    bf16 = jnp.bfloat16
    gw1p = _pad2d(gw1, LATENT_PAD, HID).astype(bf16)   # (128, 256)
    gw2p = gw2.astype(bf16)                            # (256, 256)
    gw3p = _pad2d(gw3, HID, IMG_PAD).astype(bf16)      # (256, 896), pad cols zero
    gb3p = _pad2d(gb3, 1, IMG_PAD)                     # (1, 896) f32, pad cols zero
    dw1p = _pad2d(dw1, IMG_PAD, HID).astype(bf16)      # (896, 256), pad rows zero
    dw2p = dw2.astype(bf16)                            # (256, 256)
    dw3r = dw3.T                                       # (1, 256) f32
    return (gw1p, gb1, gw2p, gb2, gw3p, gb3p,
            dw1p, db1, dw2p, db2, dw3r, db3)           # db3: (1, 1) f32


# --------------------------------------------------------------------------
# Wrapper
# --------------------------------------------------------------------------
def gan_forward(x, prep, tm=None):
    B, lat = x.shape
    assert lat == LATENT, lat

    # Batch tile: fill the MXU when the batch allows it; stay sublane-aligned
    # otherwise.  Weights are VMEM-resident across all batch tiles.
    if tm is None:
        tm = 256 if B >= 256 else max(8, _round_up(B, 8))
    b_pad = _round_up(B, tm)

    x_pad = jnp.pad(x, ((0, b_pad - B), (0, LATENT_PAD - lat))).astype(jnp.bfloat16)

    def whole(a):
        # Full-array block, constant index map -> stays resident in VMEM.
        return pl.BlockSpec(a.shape, lambda i, _nd=a.ndim: (0,) * _nd)

    in_specs = [pl.BlockSpec((tm, LATENT_PAD), lambda i: (i, 0))]
    in_specs += [whole(p) for p in prep]
    out_specs = pl.BlockSpec((tm, 1), lambda i: (i, 0))

    flops = 2 * b_pad * (LATENT_PAD * HID + HID * HID + HID * IMG_PAD
                         + IMG_PAD * HID + HID * HID + HID)
    transcendentals = b_pad * (IMG_PAD + 1)            # tanh + sigmoid
    bytes_accessed = int(x_pad.size * x_pad.dtype.itemsize
                         + sum(p.size * p.dtype.itemsize for p in prep)
                         + b_pad * 4)

    out = pl.pallas_call(
        gan_kernel,
        out_shape=jax.ShapeDtypeStruct((b_pad, 1), jnp.float32),
        grid=(b_pad // tm,),
        in_specs=in_specs,
        out_specs=out_specs,
        compiler_params=pltpu.CompilerParams(
            dimension_semantics=("parallel",)),
        cost_estimate=pl.CostEstimate(
            flops=flops,
            transcendentals=transcendentals,
            bytes_accessed=bytes_accessed),
    )(x_pad, *prep)
    return out[:B]


# --------------------------------------------------------------------------
# Pure-JAX reference (same bf16-quantized weights / bf16 dot inputs)
# --------------------------------------------------------------------------
def gan_reference(x, prep):
    (gw1, gb1, gw2, gb2, gw3, gb3, dw1, db1, dw2, db2, dw3r, db3) = prep
    bf16, f32 = jnp.bfloat16, jnp.float32

    def mm(a, w):
        return jnp.dot(a.astype(bf16), w, preferred_element_type=f32)

    xb = jnp.pad(x, ((0, 0), (0, LATENT_PAD - x.shape[1])))
    h = jnp.maximum(mm(xb, gw1) + gb1, 0.0)
    h = jnp.maximum(mm(h, gw2) + gb2, 0.0)
    g = jnp.tanh(mm(h, gw3) + gb3)
    d = mm(g, dw1) + db1
    d = jnp.where(d > 0, d, 0.2 * d)
    d = mm(d, dw2) + db2
    d = jnp.where(d > 0, d, 0.2 * d)
    logit = jnp.sum(d * dw3r, axis=-1, keepdims=True) + db3
    return jax.nn.sigmoid(logit)


if __name__ == "__main__":
    key = jax.random.PRNGKey(0)
    k_params, k_x = jax.random.split(key)

    B = 8  # small demo batch (wrapper handles any B; use >=256 to fill the MXU)
    x = jax.random.normal(k_x, (B, LATENT), jnp.float32)   # like torch.randn(B, 100)
    params = make_params(k_params)
    prep = prepare_params(params)

    out = gan_forward(x, prep)
    out = jax.block_until_ready(out)

    ref = gan_reference(x, prep)
    assert out.shape == (B, 1), out.shape
    assert jnp.allclose(out, ref, atol=1e-3, rtol=1e-3), "mismatch vs reference"

    print("KERNEL_OK")
</pallas_src>

<mosaic_0001>
module attributes {stable_mosaic.version = 11 : i64} {
  func.func @gan_kernel(%arg0: i32, %arg1: memref<8x128xbf16, #tpu.memory_space<vmem>>, %arg2: memref<128x256xbf16, #tpu.memory_space<vmem>>, %arg3: memref<1x256xf32, #tpu.memory_space<vmem>>, %arg4: memref<256x256xbf16, #tpu.memory_space<vmem>>, %arg5: memref<1x256xf32, #tpu.memory_space<vmem>>, %arg6: memref<256x896xbf16, #tpu.memory_space<vmem>>, %arg7: memref<1x896xf32, #tpu.memory_space<vmem>>, %arg8: memref<896x256xbf16, #tpu.memory_space<vmem>>, %arg9: memref<1x256xf32, #tpu.memory_space<vmem>>, %arg10: memref<256x256xbf16, #tpu.memory_space<vmem>>, %arg11: memref<1x256xf32, #tpu.memory_space<vmem>>, %arg12: memref<1x256xf32, #tpu.memory_space<vmem>>, %arg13: memref<1x1xf32, #tpu.memory_space<vmem>>, %arg14: memref<8x1xf32, #tpu.memory_space<vmem>>) attributes {dimension_semantics = [#tpu.dimension_semantics<parallel>], iteration_bounds = array<i64: 1>, scalar_prefetch = 0 : i64, scratch_operands = 0 : i64, tpu.core_type = #tpu.core_type<tc>, window_params = [{transform_indices = @transform_0, window_bounds = array<i64: 8, 128>}, {pipeline_mode = #tpu.pipeline_mode<synchronous>, transform_indices = @transform_1, window_bounds = array<i64: 128, 256>}, {pipeline_mode = #tpu.pipeline_mode<synchronous>, transform_indices = @transform_2, window_bounds = array<i64: 1, 256>}, {pipeline_mode = #tpu.pipeline_mode<synchronous>, transform_indices = @transform_3, window_bounds = array<i64: 256, 256>}, {pipeline_mode = #tpu.pipeline_mode<synchronous>, transform_indices = @transform_4, window_bounds = array<i64: 1, 256>}, {pipeline_mode = #tpu.pipeline_mode<synchronous>, transform_indices = @transform_5, window_bounds = array<i64: 256, 896>}, {pipeline_mode = #tpu.pipeline_mode<synchronous>, transform_indices = @transform_6, window_bounds = array<i64: 1, 896>}, {pipeline_mode = #tpu.pipeline_mode<synchronous>, transform_indices = @transform_7, window_bounds = array<i64: 896, 256>}, {pipeline_mode = #tpu.pipeline_mode<synchronous>, transform_indices = @transform_8, window_bounds = array<i64: 1, 256>}, {pipeline_mode = #tpu.pipeline_mode<synchronous>, transform_indices = @transform_9, window_bounds = array<i64: 256, 256>}, {pipeline_mode = #tpu.pipeline_mode<synchronous>, transform_indices = @transform_10, window_bounds = array<i64: 1, 256>}, {pipeline_mode = #tpu.pipeline_mode<synchronous>, transform_indices = @transform_11, window_bounds = array<i64: 1, 256>}, {pipeline_mode = #tpu.pipeline_mode<synchronous>, transform_indices = @transform_12, window_bounds = array<i64: 1, 1>}, {transform_indices = @transform_13, window_bounds = array<i64: 8, 1>}]} {
    %c0 = arith.constant 0 : index
    %c0_0 = arith.constant 0 : index
    %0 = vector.load %arg1[%c0, %c0_0] : memref<8x128xbf16, #tpu.memory_space<vmem>>, vector<8x128xbf16>
    %c0_1 = arith.constant 0 : index
    %c0_2 = arith.constant 0 : index
    %1 = vector.load %arg2[%c0_1, %c0_2] : memref<128x256xbf16, #tpu.memory_space<vmem>>, vector<128x256xbf16>
    %cst = arith.constant dense<0.000000e+00> : vector<8x256xf32>
    %2 = tpu.matmul %0, %1, %cst {dimension_numbers = #tpu.dot_dimension_numbers<[1], [0], [0], [1], [0, 0, 1, 1], [], []>} : vector<8x128xbf16>, vector<128x256xbf16>, vector<8x256xf32> -> vector<8x256xf32>
    %c0_3 = arith.constant 0 : index
    %c0_4 = arith.constant 0 : index
    %3 = vector.load %arg3[%c0_3, %c0_4] : memref<1x256xf32, #tpu.memory_space<vmem>>, vector<1x256xf32>
    %4 = vector.broadcast %3 : vector<1x256xf32> to vector<8x256xf32>
    %5 = arith.addf %2, %4 : vector<8x256xf32>
    %cst_5 = arith.constant 0.000000e+00 : f32
    %6 = vector.broadcast %cst_5 : f32 to vector<8x256xf32>
    %7 = arith.maximumf %5, %6 : vector<8x256xf32>
    %8 = arith.truncf %7 : vector<8x256xf32> to vector<8x256xbf16>
    %c0_6 = arith.constant 0 : index
    %c0_7 = arith.constant 0 : index
    %9 = vector.load %arg4[%c0_6, %c0_7] : memref<256x256xbf16, #tpu.memory_space<vmem>>, vector<256x256xbf16>
    %cst_8 = arith.constant dense<0.000000e+00> : vector<8x256xf32>
    %10 = tpu.matmul %8, %9, %cst_8 {dimension_numbers = #tpu.dot_dimension_numbers<[1], [0], [0], [1], [0, 0, 1, 1], [], []>} : vector<8x256xbf16>, vector<256x256xbf16>, vector<8x256xf32> -> vector<8x256xf32>
    %c0_9 = arith.constant 0 : index
    %c0_10 = arith.constant 0 : index
    %11 = vector.load %arg5[%c0_9, %c0_10] : memref<1x256xf32, #tpu.memory_space<vmem>>, vector<1x256xf32>
    %12 = vector.broadcast %11 : vector<1x256xf32> to vector<8x256xf32>
    %13 = arith.addf %10, %12 : vector<8x256xf32>
    %cst_11 = arith.constant 0.000000e+00 : f32
    %14 = vector.broadcast %cst_11 : f32 to vector<8x256xf32>
    %15 = arith.maximumf %13, %14 : vector<8x256xf32>
    %16 = arith.truncf %15 : vector<8x256xf32> to vector<8x256xbf16>
    %c0_12 = arith.constant 0 : index
    %c0_13 = arith.constant 0 : index
    %17 = vector.load %arg6[%c0_12, %c0_13] : memref<256x896xbf16, #tpu.memory_space<vmem>>, vector<256x896xbf16>
    %cst_14 = arith.constant dense<0.000000e+00> : vector<8x896xf32>
    %18 = tpu.matmul %16, %17, %cst_14 {dimension_numbers = #tpu.dot_dimension_numbers<[1], [0], [0], [1], [0, 0, 1, 1], [], []>} : vector<8x256xbf16>, vector<256x896xbf16>, vector<8x896xf32> -> vector<8x896xf32>
    %c0_15 = arith.constant 0 : index
    %c0_16 = arith.constant 0 : index
    %19 = vector.load %arg7[%c0_15, %c0_16] : memref<1x896xf32, #tpu.memory_space<vmem>>, vector<1x896xf32>
    %20 = vector.broadcast %19 : vector<1x896xf32> to vector<8x896xf32>
    %21 = arith.addf %18, %20 : vector<8x896xf32>
    %22 = math.tanh %21 : vector<8x896xf32>
    %23 = arith.truncf %22 : vector<8x896xf32> to vector<8x896xbf16>
    %c0_17 = arith.constant 0 : index
    %c0_18 = arith.constant 0 : index
    %24 = vector.load %arg8[%c0_17, %c0_18] : memref<896x256xbf16, #tpu.memory_space<vmem>>, vector<896x256xbf16>
    %cst_19 = arith.constant dense<0.000000e+00> : vector<8x256xf32>
    %25 = tpu.matmul %23, %24, %cst_19 {dimension_numbers = #tpu.dot_dimension_numbers<[1], [0], [0], [1], [0, 0, 1, 1], [], []>} : vector<8x896xbf16>, vector<896x256xbf16>, vector<8x256xf32> -> vector<8x256xf32>
    %c0_20 = arith.constant 0 : index
    %c0_21 = arith.constant 0 : index
    %26 = vector.load %arg9[%c0_20, %c0_21] : memref<1x256xf32, #tpu.memory_space<vmem>>, vector<1x256xf32>
    %27 = vector.broadcast %26 : vector<1x256xf32> to vector<8x256xf32>
    %28 = arith.addf %25, %27 : vector<8x256xf32>
    %cst_22 = arith.constant 0.000000e+00 : f32
    %29 = vector.broadcast %cst_22 : f32 to vector<8x256xf32>
    %30 = arith.cmpf ogt, %28, %29 : vector<8x256xf32>
    %cst_23 = arith.constant 2.000000e-01 : f32
    %31 = vector.broadcast %cst_23 : f32 to vector<8x256xf32>
    %32 = arith.mulf %31, %28 : vector<8x256xf32>
    %33 = arith.select %30, %28, %32 : vector<8x256xi1>, vector<8x256xf32>
    %34 = arith.truncf %33 : vector<8x256xf32> to vector<8x256xbf16>
    %c0_24 = arith.constant 0 : index
    %c0_25 = arith.constant 0 : index
    %35 = vector.load %arg10[%c0_24, %c0_25] : memref<256x256xbf16, #tpu.memory_space<vmem>>, vector<256x256xbf16>
    %cst_26 = arith.constant dense<0.000000e+00> : vector<8x256xf32>
    %36 = tpu.matmul %34, %35, %cst_26 {dimension_numbers = #tpu.dot_dimension_numbers<[1], [0], [0], [1], [0, 0, 1, 1], [], []>} : vector<8x256xbf16>, vector<256x256xbf16>, vector<8x256xf32> -> vector<8x256xf32>
    %c0_27 = arith.constant 0 : index
    %c0_28 = arith.constant 0 : index
    %37 = vector.load %arg11[%c0_27, %c0_28] : memref<1x256xf32, #tpu.memory_space<vmem>>, vector<1x256xf32>
    %38 = vector.broadcast %37 : vector<1x256xf32> to vector<8x256xf32>
    %39 = arith.addf %36, %38 : vector<8x256xf32>
    %cst_29 = arith.constant 0.000000e+00 : f32
    %40 = vector.broadcast %cst_29 : f32 to vector<8x256xf32>
    %41 = arith.cmpf ogt, %39, %40 : vector<8x256xf32>
    %cst_30 = arith.constant 2.000000e-01 : f32
    %42 = vector.broadcast %cst_30 : f32 to vector<8x256xf32>
    %43 = arith.mulf %42, %39 : vector<8x256xf32>
    %44 = arith.select %41, %39, %43 : vector<8x256xi1>, vector<8x256xf32>
    %c0_31 = arith.constant 0 : index
    %c0_32 = arith.constant 0 : index
    %45 = vector.load %arg12[%c0_31, %c0_32] : memref<1x256xf32, #tpu.memory_space<vmem>>, vector<1x256xf32>
    %46 = vector.broadcast %45 : vector<1x256xf32> to vector<8x256xf32>
    %47 = arith.mulf %44, %46 : vector<8x256xf32>
    %cst_33 = arith.constant dense<0.000000e+00> : vector<8xf32>
    %48 = vector.multi_reduction <add>, %47, %cst_33 [1] : vector<8x256xf32> to vector<8xf32>
    %49 = vector.shape_cast %48 : vector<8xf32> to vector<8x1xf32>
    %c0_34 = arith.constant 0 : index
    %c0_35 = arith.constant 0 : index
    %50 = vector.load %arg13[%c0_34, %c0_35] : memref<1x1xf32, #tpu.memory_space<vmem>>, vector<1x1xf32>
    %51 = vector.broadcast %50 : vector<1x1xf32> to vector<8x1xf32>
    %52 = arith.addf %49, %51 : vector<8x1xf32>
    %53 = arith.negf %52 : vector<8x1xf32>
    %54 = math.exp %53 : vector<8x1xf32>
    %cst_36 = arith.constant 1.000000e+00 : f32
    %55 = vector.broadcast %cst_36 : f32 to vector<8x1xf32>
    %56 = arith.addf %55, %54 : vector<8x1xf32>
    %57 = arith.divf %55, %56 : vector<8x1xf32>
    %c0_37 = arith.constant 0 : index
    %c0_38 = arith.constant 0 : index
    %58 = vector.load %arg14[%c0_37, %c0_38] : memref<8x1xf32, #tpu.memory_space<vmem>>, vector<8x1xf32>
    tpu.vector_store %arg14[%c0_37, %c0_38], %57 {strides = array<i32>} : memref<8x1xf32, #tpu.memory_space<vmem>>, vector<8x1xf32>,
    return
  }
  func.func @transform_0(%arg0: i32) -> (i32, i32) {
    %c0_i32 = arith.constant 0 : i32
    %c0_i32_0 = arith.constant 0 : i32
    return %arg0, %c0_i32 : i32, i32
  }
  func.func @transform_1(%arg0: i32) -> (i32, i32) {
    %c0_i32 = arith.constant 0 : i32
    %c0_i32_0 = arith.constant 0 : i32
    %c0_i32_1 = arith.constant 0 : i32
    return %c0_i32, %c0_i32_0 : i32, i32
  }
  func.func @transform_2(%arg0: i32) -> (i32, i32) {
    %c0_i32 = arith.constant 0 : i32
    %c0_i32_0 = arith.constant 0 : i32
    %c0_i32_1 = arith.constant 0 : i32
    return %c0_i32, %c0_i32_0 : i32, i32
  }
  func.func @transform_3(%arg0: i32) -> (i32, i32) {
    %c0_i32 = arith.constant 0 : i32
    %c0_i32_0 = arith.constant 0 : i32
    %c0_i32_1 = arith.constant 0 : i32
    return %c0_i32, %c0_i32_0 : i32, i32
  }
  func.func @transform_4(%arg0: i32) -> (i32, i32) {
    %c0_i32 = arith.constant 0 : i32
    %c0_i32_0 = arith.constant 0 : i32
    %c0_i32_1 = arith.constant 0 : i32
    return %c0_i32, %c0_i32_0 : i32, i32
  }
  func.func @transform_5(%arg0: i32) -> (i32, i32) {
    %c0_i32 = arith.constant 0 : i32
    %c0_i32_0 = arith.constant 0 : i32
    %c0_i32_1 = arith.constant 0 : i32
    return %c0_i32, %c0_i32_0 : i32, i32
  }
  func.func @transform_6(%arg0: i32) -> (i32, i32) {
    %c0_i32 = arith.constant 0 : i32
    %c0_i32_0 = arith.constant 0 : i32
    %c0_i32_1 = arith.constant 0 : i32
    return %c0_i32, %c0_i32_0 : i32, i32
  }
  func.func @transform_7(%arg0: i32) -> (i32, i32) {
    %c0_i32 = arith.constant 0 : i32
    %c0_i32_0 = arith.constant 0 : i32
    %c0_i32_1 = arith.constant 0 : i32
    return %c0_i32, %c0_i32_0 : i32, i32
  }
  func.func @transform_8(%arg0: i32) -> (i32, i32) {
    %c0_i32 = arith.constant 0 : i32
    %c0_i32_0 = arith.constant 0 : i32
    %c0_i32_1 = arith.constant 0 : i32
    return %c0_i32, %c0_i32_0 : i32, i32
  }
  func.func @transform_9(%arg0: i32) -> (i32, i32) {
    %c0_i32 = arith.constant 0 : i32
    %c0_i32_0 = arith.constant 0 : i32
    %c0_i32_1 = arith.constant 0 : i32
    return %c0_i32, %c0_i32_0 : i32, i32
  }
  func.func @transform_10(%arg0: i32) -> (i32, i32) {
    %c0_i32 = arith.constant 0 : i32
    %c0_i32_0 = arith.constant 0 : i32
    %c0_i32_1 = arith.constant 0 : i32
    return %c0_i32, %c0_i32_0 : i32, i32
  }
  func.func @transform_11(%arg0: i32) -> (i32, i32) {
    %c0_i32 = arith.constant 0 : i32
    %c0_i32_0 = arith.constant 0 : i32
    %c0_i32_1 = arith.constant 0 : i32
    return %c0_i32, %c0_i32_0 : i32, i32
  }
  func.func @transform_12(%arg0: i32) -> (i32, i32) {
    %c0_i32 = arith.constant 0 : i32
    %c0_i32_0 = arith.constant 0 : i32
    %c0_i32_1 = arith.constant 0 : i32
    return %c0_i32, %c0_i32_0 : i32, i32
  }
  func.func @transform_13(%arg0: i32) -> (i32, i32) {
    %c0_i32 = arith.constant 0 : i32
    %c0_i32_0 = arith.constant 0 : i32
    return %arg0, %c0_i32 : i32, i32
  }
}

</mosaic_0001>

<bundles_post_ra>
// kernel: tpu_custom_call.1
= control target key start
LH: loop header
LB: loop body
LE: loop exit
PB: predicated region body
PF: predicated region fallthrough
CT: control target
= control target key end

     0   :  { %s3815_s0 = inlined_call_operand.hbm [shape: bf16[8,128], index: 0, kind: input, shape index: {}]   ;;  %s3816_s1 = inlined_call_operand.hbm [shape: bf16[128,256], index: 1, kind: input, shape index: {}]   ;;  %s3817_s2 = inlined_call_operand.vmem [shape: f32[1,256], index: 2, kind: input, shape index: {}]   ;;  %s3818_s3 = inlined_call_operand.hbm [shape: bf16[256,256], index: 3, kind: input, shape index: {}]   ;;  %s3819_s4 = inlined_call_operand.vmem [shape: f32[1,256], index: 4, kind: input, shape index: {}]   ;;  %s3820_s5 = inlined_call_operand.hbm [shape: bf16[256,896], index: 5, kind: input, shape index: {}]   ;;  %s3821_s6 = inlined_call_operand.vmem [shape: f32[1,896], index: 6, kind: input, shape index: {}]   ;;  %s3822_s7 = inlined_call_operand.hbm [shape: bf16[896,256], index: 7, kind: input, shape index: {}]   ;;  %s3823_s8 = inlined_call_operand.vmem [shape: f32[1,256], index: 8, kind: input, shape index: {}]   ;;  %s3824_s9 = inlined_call_operand.hbm [shape: bf16[256,256], index: 9, kind: input, shape index: {}]   ;;  %s3825_s10 = inlined_call_operand.vmem [shape: f32[1,256], index: 10, kind: input, shape index: {}]   ;;  %s3826_s11 = inlined_call_operand.vmem [shape: f32[1,256], index: 11, kind: input, shape index: {}]   ;;  %s3827_s12 = inlined_call_operand.<no memory space> [shape: f32[1,1], index: 12, kind: input, shape index: {}]   ;;  %s3828_s13 = inlined_call_operand.vmem [shape: f32[8,1], index: 13, kind: output, shape index: {}]  }
   0x1   :  { %v18_v0 = vstv %s3827_s12 }
   0x2   :  { %19 = vst [vmem:[#allocation2] sm:$0x1] %v18_v0 }
   0x3   :  { %20 = vsyncpa [#allocation4], 0 }
   0x4   :  { %21 = vsyncpa [#allocation6], 0 }
   0x5   :  { %22 = vsyncpa [#allocation9], 0 }
   0x6   :  { %23 = vsyncpa [#allocation12], 0  ;;  %s3555_s27 = smov [#allocation5]   ;;  %s3415_s14 = scalar_lea.hbm %s3816_s1, 2048 }
   0x7   :  { %s39_s28 = sshll.u32 %s3555_s27, 4  ;;  %p3416_p0 = scmp.ne.s32.totalorder %s3816_s1, %s3415_s14  ;;  %s40_s28 = int_to_ptr.vmem [resolvable:$true] %s39_s28 }
   0x8   :  { %p3419_p1 = scmp.lt.u32.totalorder %s3415_s14, %s3816_s1 }
   0xa   :  { %p3421_p2 = pnand %p3419_p1, %p3416_p0 }
   0xc   :  { %3424 = shalt.err (!%p3421_p2)
}
   0xd   :  { %s3425_s12 = scalar_lea.vmem %s40_s28, 2048  ;;  %p3430_p4 = scmp.lt.s32.totalorder %s40_s28, %s40_s28 }
   0xe   :  { %p3426_p3 = scmp.ne.s32.totalorder %s40_s28, %s3425_s12  ;;  %p3431_p5 = scmp.lt.s32.totalorder %s3425_s12, %s3425_s12 }
  0x10   :  { %p3432_p6 = por %p3431_p5, %p3430_p4 }
  0x12   :  { %p3433_p7 = pnand %p3432_p6, %p3426_p3 }
  0x14   :  { %3436 = shalt.err (!%p3433_p7)
}
  0x15   :  { %s3556_s19 = smov 128   ;;  %s3557_s20 = smov 8  }
  0x16   :  { %45 = dma.hbm_to_vmem [thread:$0]  %s3816_s1, 2048, %s40_s28, [#allocation6], %s3556_s19, %s3556_s19, %s3557_s20  }
  0x17   :  { %s3558_s23 = smov [#allocation8]   ;;  %s3437_s27 = scalar_lea.hbm %s3820_s5, 14336 }
  0x18   :  { %s67_s24 = sshll.u32 %s3558_s23, 4  ;;  %p3438_p8 = scmp.ne.s32.totalorder %s3820_s5, %s3437_s27  ;;  %s68_s24 = int_to_ptr.vmem [resolvable:$true] %s67_s24 }
  0x19   :  { %p3441_p9 = scmp.lt.u32.totalorder %s3437_s27, %s3820_s5 }
  0x1b   :  { %p3443_p10 = pnand %p3441_p9, %p3438_p8 }
  0x1d   :  { %3446 = shalt.err (!%p3443_p10)
}
  0x1e   :  { %s3447_s16 = scalar_lea.vmem %s68_s24, 14336  ;;  %p3452_p12 = scmp.lt.s32.totalorder %s68_s24, %s68_s24 }
  0x1f   :  { %p3448_p11 = scmp.ne.s32.totalorder %s68_s24, %s3447_s16  ;;  %p3453_p13 = scmp.lt.s32.totalorder %s3447_s16, %s3447_s16 }
  0x21   :  { %p3454_p0 = por %p3453_p13, %p3452_p12 }
  0x23   :  { %p3455_p1 = pnand %p3454_p0, %p3448_p11 }
  0x25   :  { %3458 = shalt.err (!%p3455_p1)
}
  0x26   :  { %s3559_s1 = smov 448   ;;  %s3560_s28 = smov 28  }
  0x27   :  { %73 = dma.hbm_to_vmem [thread:$0]  %s3820_s5, 14336, %s68_s24, [#allocation9], %s3559_s1, %s3559_s1, %s3560_s28  }
  0x28   :  { %s3561_s12 = smov [#allocation3]   ;;  %s3562_s22 = smov [#allocation7]  }
  0x29   :  { %s30_s21 = sshll.u32 %s3561_s12, 4  ;;  %s53_s23 = sshll.u32 %s3562_s22, 4  ;;  %s31_s21 = int_to_ptr.vmem [resolvable:$true] %s30_s21  ;;  %s3666_s23 = int_to_ptr.vmem [resolvable:$true] %s53_s23 }
  0x2a   :  { %s3459_s27 = scalar_lea.hbm %s3815_s0, 64 }
  0x2b   :  { %p3460_p2 = scmp.ne.s32.totalorder %s3815_s0, %s3459_s27  ;;  %p3463_p3 = scmp.lt.u32.totalorder %s3459_s27, %s3815_s0 }
  0x2d   :  { %p3465_p4 = pnand %p3463_p3, %p3460_p2 }
  0x2f   :  { %3468 = shalt.err (!%p3465_p4)
}
  0x30   :  { %s3469_s5 = scalar_lea.vmem %s31_s21, 64  ;;  %p3474_p6 = scmp.lt.s32.totalorder %s31_s21, %s31_s21 }
  0x31   :  { %p3470_p5 = scmp.ne.s32.totalorder %s31_s21, %s3469_s5  ;;  %p3475_p7 = scmp.lt.s32.totalorder %s3469_s5, %s3469_s5 }
  0x33   :  { %p3476_p8 = por %p3475_p7, %p3474_p6 }
  0x35   :  { %p3477_p9 = pnand %p3476_p8, %p3470_p5 }
  0x37   :  { %3480 = shalt.err (!%p3477_p9)
}
  0x38   :  { %33 = dma.hbm_to_vmem [thread:$0]  %s3815_s0, 64, %s31_s21, [#allocation4]  }
  0x39   :  { %s3481_s17 = scalar_lea.hbm %s3818_s3, 4096 }
  0x3a   :  { %p3482_p10 = scmp.ne.s32.totalorder %s3818_s3, %s3481_s17  ;;  %p3485_p11 = scmp.lt.u32.totalorder %s3481_s17, %s3818_s3 }
  0x3c   :  { %p3487_p12 = pnand %p3485_p11, %p3482_p10 }
  0x3e   :  { %3490 = shalt.err (!%p3487_p12)
}
  0x3f   :  { %s3491_s26 = scalar_lea.vmem %s3666_s23, 4096  ;;  %p3496_p0 = scmp.lt.s32.totalorder %s3666_s23, %s3666_s23 }
  0x40   :  { %p3492_p13 = scmp.ne.s32.totalorder %s3666_s23, %s3491_s26  ;;  %p3497_p1 = scmp.lt.s32.totalorder %s3491_s26, %s3491_s26 }
  0x42   :  { %p3498_p2 = por %p3497_p1, %p3496_p0 }
  0x44   :  { %p3499_p3 = pnand %p3498_p2, %p3492_p13 }
  0x46   :  { %3502 = shalt.err (!%p3499_p3)
}
  0x47   :  { %59 = dma.hbm_to_vmem [thread:$0]  %s3818_s3, 4096, %s3666_s23, [#allocation6], %s3556_s19, %s3556_s19, %s3557_s20  }
  0x48   :  { %s3563_s27 = smov [#allocation10]   ;;  %s3564_s30 = smov [#allocation11]  }
  0x49   :  { %s81_s29 = sshll.u32 %s3563_s27, 4  ;;  %s95_s14 = sshll.u32 %s3564_s30, 4  ;;  %s82_s29 = int_to_ptr.vmem [resolvable:$true] %s81_s29  ;;  %s3700_s14 = int_to_ptr.vmem [resolvable:$true] %s95_s14 }
  0x4a   :  { %s3503_s24 = scalar_lea.hbm %s3822_s7, 14336 }
  0x4b   :  { %p3504_p4 = scmp.ne.s32.totalorder %s3822_s7, %s3503_s24  ;;  %p3507_p5 = scmp.lt.u32.totalorder %s3503_s24, %s3822_s7 }
  0x4d   :  { %p3509_p6 = pnand %p3507_p5, %p3504_p4 }
  0x4f   :  { %3512 = shalt.err (!%p3509_p6)
}
  0x50   :  { %s3513_s3 = scalar_lea.vmem %s82_s29, 14336  ;;  %p3518_p8 = scmp.lt.s32.totalorder %s82_s29, %s82_s29 }
  0x51   :  { %p3514_p7 = scmp.ne.s32.totalorder %s82_s29, %s3513_s3  ;;  %p3519_p9 = scmp.lt.s32.totalorder %s3513_s3, %s3513_s3 }
  0x53   :  { %p3520_p10 = por %p3519_p9, %p3518_p8 }
  0x55   :  { %p3521_p11 = pnand %p3520_p10, %p3514_p7 }
  0x57   :  { %3524 = shalt.err (!%p3521_p11)
}
  0x58   :  { %87 = dma.hbm_to_vmem [thread:$0]  %s3822_s7, 14336, %s82_s29, [#allocation9], %s3556_s19, %s3556_s19, %s3557_s20  }
  0x59   :  { %s3525_s25 = scalar_lea.hbm %s3824_s9, 4096 }
  0x5a   :  { %p3526_p12 = scmp.ne.s32.totalorder %s3824_s9, %s3525_s25  ;;  %p3529_p13 = scmp.lt.u32.totalorder %s3525_s25, %s3824_s9 }
  0x5c   :  { %p3531_p0 = pnand %p3529_p13, %p3526_p12 }
  0x5e   :  { %3534 = shalt.err (!%p3531_p0)
}
  0x5f   :  { %s3535_s30 = scalar_lea.vmem %s3700_s14, 4096  ;;  %p3540_p2 = scmp.lt.s32.totalorder %s3700_s14, %s3700_s14 }
  0x60   :  { %p3536_p1 = scmp.ne.s32.totalorder %s3700_s14, %s3535_s30  ;;  %p3541_p3 = scmp.lt.s32.totalorder %s3535_s30, %s3535_s30 }
  0x62   :  { %p3542_p4 = por %p3541_p3, %p3540_p2 }
  0x64   :  { %p3543_p5 = pnand %p3542_p4, %p3536_p1 }
  0x66   :  { %3546 = shalt.err (!%p3543_p5)
}
  0x67   :  { %101 = dma.hbm_to_vmem [thread:$0]  %s3824_s9, 4096, %s3700_s14, [#allocation12], %s3556_s19, %s3556_s19, %s3557_s20  }
  0x68   :  { %3547 = dma.done.wait [#allocation4], 64  }
  0x69   :  { %3548 = vsyncadd [#allocation4], 4294967232 }
  0x6a   :  { %3549 = dma.done.wait [#allocation6], 6144  }
  0x6b   :  { %3550 = vsyncadd [#allocation6], 4294961152 }
  0x6c   :  { %3551 = dma.done.wait [#allocation9], 28672  }
  0x6d   :  { %3552 = vsyncadd [#allocation9], 4294938624 }
  0x6e   :  { %3553 = dma.done.wait [#allocation12], 4096  }
  0x6f   :  { %3554 = vsyncadd [#allocation12], 4294963200  ;;  %v3565_v1 = vmov 0   ;;  %v2949_v2 = vld [vmem:[#allocation5 + $0x4] ss:$8 sps:$4 sm:$0xff]   ;;  %vm2586_vm4 = vcmask 7168  }
  0x70   :  { %268 = vmatprep.mubr.bf16.mxu0 %v3565_v1  ;;  %v2951_v3 = vld [vmem:[#allocation5] ss:$8 sps:$4 sm:$0xff]   ;;  %236 = vmatprep.subr.bf16.mxu0 %v2949_v2  ;;  %v2952_v4 = vld [vmem:[#allocation5 + $0x14] ss:$8 sps:$4 sm:$0xff]   ;;  %v2954_v5 = vld [vmem:[#allocation5 + $0x10] ss:$8 sps:$4 sm:$0xff]  }
  0x71   :  { %237 = vmatpush1.bf16.msra.mxu0 %v2951_v3  ;;  %v2955_v6 = vld [vmem:[#allocation5 + $0x24] ss:$8 sps:$4 sm:$0xff]   ;;  %v2957_v7 = vld [vmem:[#allocation5 + $0x20] ss:$8 sps:$4 sm:$0xff]   ;;  %v2958_v8 = vld [vmem:[#allocation5 + $0x34] ss:$8 sps:$4 sm:$0xff]  }
  0x72   :  { %238 = vmatprep.subr.bf16.mxu0 %v2952_v4  ;;  %v2960_v9 = vld [vmem:[#allocation5 + $0x30] ss:$8 sps:$4 sm:$0xff]   ;;  %v2961_v10 = vld [vmem:[#allocation5 + $0x44] ss:$8 sps:$4 sm:$0xff]   ;;  %v2975_v12 = vld [vmem:[#allocation7] ss:$8 sps:$4 sm:$0xff]  }
  0x73   :  { %v2973_v11 = vld [vmem:[#allocation7 + $0x4] ss:$8 sps:$4 sm:$0xff]   ;;  %v2976_v13 = vld [vmem:[#allocation7 + $0x14] ss:$8 sps:$4 sm:$0xff]   ;;  %v2963_v14 = vld [vmem:[#allocation5 + $0x40] ss:$8 sps:$4 sm:$0xff]  }
  0x74   :  { %485 = vmatprep.subr.bf16.mxu1 %v2973_v11  ;;  %v2978_v15 = vld [vmem:[#allocation7 + $0x10] ss:$8 sps:$4 sm:$0xff]   ;;  %v2979_v16 = vld [vmem:[#allocation7 + $0x24] ss:$8 sps:$4 sm:$0xff]   ;;  %v2964_v17 = vld [vmem:[#allocation5 + $0x54] ss:$8 sps:$4 sm:$0xff]  }
  0x75   :  { %239 = vmatpush1.bf16.msra.mxu0 %v2954_v5  ;;  %486 = vmatpush1.bf16.msra.mxu1 %v2975_v12  ;;  %v2966_v18 = vld [vmem:[#allocation5 + $0x50] ss:$8 sps:$4 sm:$0xff]   ;;  %v2981_v19 = vld [vmem:[#allocation7 + $0x20] ss:$8 sps:$4 sm:$0xff]   ;;  %v2982_v20 = vld [vmem:[#allocation7 + $0x34] ss:$8 sps:$4 sm:$0xff]  }
  0x76   :  { %240 = vmatprep.subr.bf16.mxu0 %v2955_v6  ;;  %487 = vmatprep.subr.bf16.mxu1 %v2976_v13  ;;  %v2967_v21 = vld [vmem:[#allocation5 + $0x64] ss:$8 sps:$4 sm:$0xff]   ;;  %v2969_v22 = vld [vmem:[#allocation5 + $0x60] ss:$8 sps:$4 sm:$0xff]   ;;  %v2984_v23 = vld [vmem:[#allocation7 + $0x30] ss:$8 sps:$4 sm:$0xff]  }
  0x77   :  { %v2985_v24 = vld [vmem:[#allocation7 + $0x44] ss:$8 sps:$4 sm:$0xff]   ;;  %v2970_v25 = vld [vmem:[#allocation5 + $0x74] ss:$8 sps:$4 sm:$0xff]   ;;  %v2972_v26 = vld [vmem:[#allocation5 + $0x70] ss:$8 sps:$4 sm:$0xff]  }
  0x78   :  { %v2987_v27 = vld [vmem:[#allocation7 + $0x40] ss:$8 sps:$4 sm:$0xff]   ;;  %v2988_v28 = vld [vmem:[#allocation7 + $0x54] ss:$8 sps:$4 sm:$0xff]   ;;  %v2990_v30 = vld [vmem:[#allocation7 + $0x50] ss:$8 sps:$4 sm:$0xff]  }
  0x79   :  { %241 = vmatpush1.bf16.msra.mxu0 %v2957_v7  ;;  %488 = vmatpush1.bf16.msra.mxu1 %v2978_v15  ;;  %v127_v29 = vld [vmem:[#allocation3] sm:$0xf]  ;;  %v2991_v31 = vld [vmem:[#allocation7 + $0x64] ss:$8 sps:$4 sm:$0xff]   ;;  %v2993_v32 = vld [vmem:[#allocation7 + $0x60] ss:$8 sps:$4 sm:$0xff]  }
  0x7a   :  { %242 = vmatprep.subr.bf16.mxu0 %v2958_v8  ;;  %489 = vmatprep.subr.bf16.mxu1 %v2979_v16  ;;  %v2994_v33 = vld [vmem:[#allocation7 + $0x74] ss:$8 sps:$4 sm:$0xff]   ;;  %v2996_v34 = vld [vmem:[#allocation7 + $0x70] ss:$8 sps:$4 sm:$0xff]   ;;  %v2997_v35 = vld [vmem:[#allocation7 + $0x84] ss:$8 sps:$4 sm:$0xff]  }
  0x7b   :  { %v2999_v36 = vld [vmem:[#allocation7 + $0x80] ss:$8 sps:$4 sm:$0xff]   ;;  %v3000_v37 = vld [vmem:[#allocation7 + $0x94] ss:$8 sps:$4 sm:$0xff]   ;;  %v3002_v38 = vld [vmem:[#allocation7 + $0x90] ss:$8 sps:$4 sm:$0xff]  }
  0x7c   :  { %v3003_v39 = vld [vmem:[#allocation7 + $0xa4] ss:$8 sps:$4 sm:$0xff]   ;;  %v3005_v40 = vld [vmem:[#allocation7 + $0xa0] ss:$8 sps:$4 sm:$0xff]   ;;  %v3006_v41 = vld [vmem:[#allocation7 + $0xb4] ss:$8 sps:$4 sm:$0xff]  }
  0x7d   :  { %243 = vmatpush1.bf16.msra.mxu0 %v2960_v9  ;;  %490 = vmatpush1.bf16.msra.mxu1 %v2981_v19  ;;  %v3008_v42 = vld [vmem:[#allocation7 + $0xb0] ss:$8 sps:$4 sm:$0xff]   ;;  %v3009_v43 = vld [vmem:[#allocation7 + $0xc4] ss:$8 sps:$4 sm:$0xff]   ;;  %v3011_v44 = vld [vmem:[#allocation7 + $0xc0] ss:$8 sps:$4 sm:$0xff]  }
  0x7e   :  { %244 = vmatprep.subr.bf16.mxu0 %v2961_v10  ;;  %491 = vmatprep.subr.bf16.mxu1 %v2982_v20  ;;  %v3012_v45 = vld [vmem:[#allocation7 + $0xd4] ss:$8 sps:$4 sm:$0xff]   ;;  %v3014_v46 = vld [vmem:[#allocation7 + $0xd0] ss:$8 sps:$4 sm:$0xff]   ;;  %v3015_v47 = vld [vmem:[#allocation7 + $0xe4] ss:$8 sps:$4 sm:$0xff]  }
  0x7f   :  { %v3017_v48 = vld [vmem:[#allocation7 + $0xe0] ss:$8 sps:$4 sm:$0xff]   ;;  %v3018_v49 = vld [vmem:[#allocation7 + $0xf4] ss:$8 sps:$4 sm:$0xff]   ;;  %v3020_v50 = vld [vmem:[#allocation7 + $0xf0] ss:$8 sps:$4 sm:$0xff]  }
  0x80   :  { %v3023_v51 = vld [vmem:[#allocation8 + $0x4] ss:$28 sps:$4 sm:$0xff]   ;;  %v3024_v52 = vld [vmem:[#allocation8 + $0x10] ss:$28 sps:$4 sm:$0xff]   ;;  %v3042_v58 = vld [vmem:[#allocation8 + $0xb8] ss:$28 sps:$4 sm:$0xff]  }
  0x81   :  { %245 = vmatpush1.bf16.msra.mxu0 %v2963_v14  ;;  %492 = vmatpush1.bf16.msra.mxu1 %v2984_v23  ;;  %v3026_v53 = vld [vmem:[#allocation8 + $0x14] ss:$28 sps:$4 sm:$0xff]   ;;  %v3030_v54 = vld [vmem:[#allocation8 + $0x48] ss:$28 sps:$4 sm:$0xff]   ;;  %v3036_v56 = vld [vmem:[#allocation8 + $0x80] ss:$28 sps:$4 sm:$0xff]  }
  0x82   :  { %246 = vmatprep.subr.bf16.mxu0 %v2964_v17  ;;  %493 = vmatprep.subr.bf16.mxu1 %v2985_v24  ;;  %v3032_v55 = vld [vmem:[#allocation8 + $0x4c] ss:$28 sps:$4 sm:$0xff]   ;;  %v3038_v57 = vld [vmem:[#allocation8 + $0x84] ss:$28 sps:$4 sm:$0xff]   ;;  %v3044_v59 = vld [vmem:[#allocation8 + $0xbc] ss:$28 sps:$4 sm:$0xff]   ;;  %v146_v17 = vlaneseq }
  0x83   :  { %v3048_v60 = vld [vmem:[#allocation8 + $0xf0] ss:$28 sps:$4 sm:$0xff]   ;;  %v3054_v62 = vld [vmem:[#allocation8 + $0x128] ss:$28 sps:$4 sm:$0xff]   ;;  %v3060_v0 = vld [vmem:[#allocation8 + $0x160] ss:$28 sps:$4 sm:$0xff]  }
  0x84   :  { %v3050_v61 = vld [vmem:[#allocation8 + $0xf4] ss:$28 sps:$4 sm:$0xff]   ;;  %v3056_v63 = vld [vmem:[#allocation8 + $0x12c] ss:$28 sps:$4 sm:$0xff]   ;;  %v3062_v2 = vld [vmem:[#allocation8 + $0x164] ss:$28 sps:$4 sm:$0xff]  }
  0x85   :  { %247 = vmatpush1.bf16.msra.mxu0 %v2966_v18  ;;  %494 = vmatpush1.bf16.msra.mxu1 %v2987_v27  ;;  %v3066_v3 = vld [vmem:[#allocation8 + $0x198] ss:$28 sps:$4 sm:$0xff]   ;;  %v3072_v5 = vld [vmem:[#allocation8 + $0x1d0] ss:$28 sps:$4 sm:$0xff]   ;;  %v3078_v7 = vld [vmem:[#allocation8 + $0x208] ss:$28 sps:$4 sm:$0xff]  }
  0x86   :  { %248 = vmatprep.subr.bf16.mxu0 %v2967_v21  ;;  %495 = vmatprep.subr.bf16.mxu1 %v2988_v28  ;;  %v3068_v4 = vld [vmem:[#allocation8 + $0x19c] ss:$28 sps:$4 sm:$0xff]   ;;  %v3074_v6 = vld [vmem:[#allocation8 + $0x1d4] ss:$28 sps:$4 sm:$0xff]   ;;  %v3080_v8 = vld [vmem:[#allocation8 + $0x20c] ss:$28 sps:$4 sm:$0xff]  }
  0x87   :  { %v3084_v9 = vld [vmem:[#allocation8 + $0x240] ss:$28 sps:$4 sm:$0xff]   ;;  %v3090_v11 = vld [vmem:[#allocation8 + $0x278] ss:$28 sps:$4 sm:$0xff]   ;;  %v3096_v13 = vld [vmem:[#allocation8 + $0x2b0] ss:$28 sps:$4 sm:$0xff]  }
  0x88   :  { %v3086_v10 = vld [vmem:[#allocation8 + $0x244] ss:$28 sps:$4 sm:$0xff]   ;;  %v3092_v12 = vld [vmem:[#allocation8 + $0x27c] ss:$28 sps:$4 sm:$0xff]   ;;  %v3098_v14 = vld [vmem:[#allocation8 + $0x2b4] ss:$28 sps:$4 sm:$0xff]  }
  0x89   :  { %249 = vmatpush1.bf16.msra.mxu0 %v2969_v22  ;;  %496 = vmatpush1.bf16.msra.mxu1 %v2990_v30  ;;  %v3102_v15 = vld [vmem:[#allocation8 + $0x2e8] ss:$28 sps:$4 sm:$0xff]   ;;  %v3738_v18 = vshrl.u32 %v146_v17, 7  ;;  %v144_v20 = vld [vmem:[%s3817_s2] sm:$0x3] }
  0x8a   :  { %250 = vmatprep.subr.bf16.mxu0 %v2970_v25  ;;  %497 = vmatprep.subr.bf16.mxu1 %v2991_v31  ;;  %v3104_v16 = vld [vmem:[#allocation8 + $0x2ec] ss:$28 sps:$4 sm:$0xff]  }
  0x8b   :  { %v3741_v19 = vsub.s32 0, %v3738_v18  ;;  %v3747_v21 = vsub.s32 1, %v3738_v18 }
  0x8d   :  { %251 = vmatpush1.bf16.msra.mxu0 %v2972_v26  ;;  %498 = vmatpush1.bf16.msra.mxu1 %v2993_v32  ;;  %v149_v22 = vrot.slane %v144_v20, %v3741_v19  ;;  %v153_v23 = vrot.slane %v144_v20, %v3747_v21 }
  0x8e   :  { %499 = vmatprep.subr.bf16.mxu1 %v2994_v33  ;;  %1353 = vmatprep.subr.bf16.mxu0 %v3026_v53  ;;  %v3021_v33 = vld [vmem:[#allocation8] ss:$28 sps:$4 sm:$0xff]   ;;  %v3083_v53 = vld [vmem:[#allocation8 + $0x234] ss:$28 sps:$4 sm:$0xff]  }
  0x90   :  { %269 = vmatmul.mubr.bf16.vlgmr.msra.gmra.mrb[0].mxu0 %v127_v29 }
  0x91   :  { %500 = vmatpush1.bf16.msra.mxu1 %v2996_v34  ;;  %1354 = vmatpush1.bf16.msra.mxu0 %v3024_v52  ;;  %v3075_v52 = vld [vmem:[#allocation8 + $0x1f8] ss:$28 sps:$4 sm:$0xff]  }
  0x92   :  { %501 = vmatprep.subr.bf16.mxu1 %v2997_v35  ;;  %1355 = vmatprep.subr.bf16.mxu0 %v3032_v55  ;;  %v3029_v35 = vld [vmem:[#allocation8 + $0x3c] ss:$28 sps:$4 sm:$0xff]   ;;  %v3089_v55 = vld [vmem:[#allocation8 + $0x26c] ss:$28 sps:$4 sm:$0xff]  }
  0x95   :  { %502 = vmatpush1.bf16.msra.mxu1 %v2999_v36  ;;  %1356 = vmatpush1.bf16.msra.mxu0 %v3030_v54  ;;  %v3027_v36 = vld [vmem:[#allocation8 + $0x38] ss:$28 sps:$4 sm:$0xff]   ;;  %v3081_v54 = vld [vmem:[#allocation8 + $0x230] ss:$28 sps:$4 sm:$0xff]  }
  0x96   :  { %503 = vmatprep.subr.bf16.mxu1 %v3000_v37  ;;  %1357 = vmatprep.subr.bf16.mxu0 %v3038_v57  ;;  %v3035_v37 = vld [vmem:[#allocation8 + $0x74] ss:$28 sps:$4 sm:$0xff]   ;;  %v3095_v57 = vld [vmem:[#allocation8 + $0x2a4] ss:$28 sps:$4 sm:$0xff]  }
  0x99   :  { %504 = vmatpush1.bf16.msra.mxu1 %v3002_v38  ;;  %1358 = vmatpush1.bf16.msra.mxu0 %v3036_v56  ;;  %v3033_v38 = vld [vmem:[#allocation8 + $0x70] ss:$28 sps:$4 sm:$0xff]   ;;  %v3087_v56 = vld [vmem:[#allocation8 + $0x268] ss:$28 sps:$4 sm:$0xff]  }
  0x9a   :  { %505 = vmatprep.subr.bf16.mxu1 %v3003_v39  ;;  %1359 = vmatprep.subr.bf16.mxu0 %v3044_v59  ;;  %v3041_v39 = vld [vmem:[#allocation8 + $0xac] ss:$28 sps:$4 sm:$0xff]   ;;  %v3101_v59 = vld [vmem:[#allocation8 + $0x2dc] ss:$28 sps:$4 sm:$0xff]  }
  0x9d   :  { %506 = vmatpush1.bf16.msra.mxu1 %v3005_v40  ;;  %1360 = vmatpush1.bf16.msra.mxu0 %v3042_v58  ;;  %v3039_v40 = vld [vmem:[#allocation8 + $0xa8] ss:$28 sps:$4 sm:$0xff]   ;;  %v3093_v58 = vld [vmem:[#allocation8 + $0x2a0] ss:$28 sps:$4 sm:$0xff]  }
  0x9e   :  { %507 = vmatprep.subr.bf16.mxu1 %v3006_v41  ;;  %1361 = vmatprep.subr.bf16.mxu0 %v3050_v61  ;;  %v3047_v41 = vld [vmem:[#allocation8 + $0xe4] ss:$28 sps:$4 sm:$0xff]   ;;  %v3107_v61 = vld [vmem:[#allocation8 + $0x314] ss:$28 sps:$4 sm:$0xff]  }
  0xa1   :  { %508 = vmatpush1.bf16.msra.mxu1 %v3008_v42  ;;  %1362 = vmatpush1.bf16.msra.mxu0 %v3048_v60  ;;  %v3045_v42 = vld [vmem:[#allocation8 + $0xe0] ss:$28 sps:$4 sm:$0xff]   ;;  %v3099_v60 = vld [vmem:[#allocation8 + $0x2d8] ss:$28 sps:$4 sm:$0xff]  }
  0xa2   :  { %509 = vmatprep.subr.bf16.mxu1 %v3009_v43  ;;  %1363 = vmatprep.subr.bf16.mxu0 %v3056_v63  ;;  %v3053_v43 = vld [vmem:[#allocation8 + $0x11c] ss:$28 sps:$4 sm:$0xff]   ;;  %v3110_v63 = vld [vmem:[#allocation8 + $0x324] ss:$28 sps:$4 sm:$0xff]  }
  0xa5   :  { %510 = vmatpush1.bf16.msra.mxu1 %v3011_v44  ;;  %1364 = vmatpush1.bf16.msra.mxu0 %v3054_v62  ;;  %v3051_v44 = vld [vmem:[#allocation8 + $0x118] ss:$28 sps:$4 sm:$0xff]   ;;  %v3105_v62 = vld [vmem:[#allocation8 + $0x310] ss:$28 sps:$4 sm:$0xff]  }
  0xa6   :  { %511 = vmatprep.subr.bf16.mxu1 %v3012_v45  ;;  %1365 = vmatprep.subr.bf16.mxu0 %v3062_v2  ;;  %v3059_v45 = vld [vmem:[#allocation8 + $0x154] ss:$28 sps:$4 sm:$0xff]   ;;  %v3113_v2 = vld [vmem:[#allocation8 + $0x34c] ss:$28 sps:$4 sm:$0xff]  }
  0xa9   :  { %512 = vmatpush1.bf16.msra.mxu1 %v3014_v46  ;;  %1366 = vmatpush1.bf16.msra.mxu0 %v3060_v0  ;;  %v3057_v46 = vld [vmem:[#allocation8 + $0x150] ss:$28 sps:$4 sm:$0xff]   ;;  %v3108_v0 = vld [vmem:[#allocation8 + $0x320] ss:$28 sps:$4 sm:$0xff]  }
  0xaa   :  { %513 = vmatprep.subr.bf16.mxu1 %v3015_v47  ;;  %1367 = vmatprep.subr.bf16.mxu0 %v3068_v4  ;;  %v3065_v47 = vld [vmem:[#allocation8 + $0x18c] ss:$28 sps:$4 sm:$0xff]   ;;  %v3116_v4 = vld [vmem:[#allocation8 + $0x35c] ss:$28 sps:$4 sm:$0xff]  }
  0xad   :  { %514 = vmatpush1.bf16.msra.mxu1 %v3017_v48  ;;  %1368 = vmatpush1.bf16.msra.mxu0 %v3066_v3  ;;  %v3063_v48 = vld [vmem:[#allocation8 + $0x188] ss:$28 sps:$4 sm:$0xff]  }
  0xae   :  { %515 = vmatprep.subr.bf16.mxu1 %v3018_v49  ;;  %1369 = vmatprep.subr.bf16.mxu0 %v3074_v6  ;;  %v3071_v49 = vld [vmem:[#allocation8 + $0x1c4] ss:$28 sps:$4 sm:$0xff]   ;;  %v3119_v6 = vld [vmem:[#allocation8 + $0xc] ss:$28 sps:$4 sm:$0xff]  }
  0xaf   :  { %v3111_v3 = vld [vmem:[#allocation8 + $0x348] ss:$28 sps:$4 sm:$0xff]  }
  0xb1   :  { %516 = vmatpush1.bf16.msra.mxu1 %v3020_v50  ;;  %1370 = vmatpush1.bf16.msra.mxu0 %v3072_v5  ;;  %v3069_v50 = vld [vmem:[#allocation8 + $0x1c0] ss:$28 sps:$4 sm:$0xff]   ;;  %v3114_v5 = vld [vmem:[#allocation8 + $0x358] ss:$28 sps:$4 sm:$0xff]  }
  0xb2   :  { %1271 = vmatprep.subr.bf16.mxu1 %v3023_v51  ;;  %1371 = vmatprep.subr.bf16.mxu0 %v3080_v8  ;;  %v3077_v51 = vld [vmem:[#allocation8 + $0x1fc] ss:$28 sps:$4 sm:$0xff]  }
  0xb3   :  { %v313_v8 = vld [vmem:[%s3819_s4] sm:$0x3] }
  0xb5   :  { %1372 = vmatpush1.bf16.msra.mxu0 %v3078_v7  ;;  %v3183_v7 = vld [vmem:[#allocation10 + $0x4] ss:$8 sps:$4 sm:$0xff]  }
  0xb6   :  { %1373 = vmatprep.subr.bf16.mxu0 %v3086_v10  ;;  %v322_v10 = vrot.slane %v313_v8, %v3747_v21 }
  0xb9   :  { %1374 = vmatpush1.bf16.msra.mxu0 %v3084_v9  ;;  %v318_v9 = vrot.slane %v313_v8, %v3741_v19  ;;  %v3153_v8 = vld [vmem:[#allocation8 + $0x2a8] ss:$28 sps:$4 sm:$0xff]  }
  0xba   :  { %1375 = vmatprep.subr.bf16.mxu0 %v3092_v12 }
  0xbd   :  { %1376 = vmatpush1.bf16.msra.mxu0 %v3090_v11 }
  0xbe   :  { %1377 = vmatprep.subr.bf16.mxu0 %v3098_v14 }
  0xc1   :  { %1378 = vmatpush1.bf16.msra.mxu0 %v3096_v13 }
  0xc2   :  { %1379 = vmatprep.subr.bf16.mxu0 %v3104_v16 }
  0xc5   :  { %1380 = vmatpush1.bf16.msra.mxu0 %v3102_v15 }
  0xc6   :  { %1381 = vmatprep.subr.bf16.mxu0 %v3110_v63  ;;  %v3213_v63 = vld [vmem:[#allocation10 + $0xa4] ss:$8 sps:$4 sm:$0xff]  }
  0xc9   :  { %1382 = vmatpush1.bf16.msra.mxu0 %v3108_v0  ;;  %v3147_v0 = vld [vmem:[#allocation8 + $0x238] ss:$28 sps:$4 sm:$0xff]  }
  0xca   :  { %1383 = vmatprep.subr.bf16.mxu0 %v3116_v4  ;;  %v3216_v4 = vld [vmem:[#allocation10 + $0xb4] ss:$8 sps:$4 sm:$0xff]  }
  0xcd   :  { %1384 = vmatpush1.bf16.msra.mxu0 %v3114_v5  ;;  %v3150_v5 = vld [vmem:[#allocation8 + $0x270] ss:$28 sps:$4 sm:$0xff]  }
  0xce   :  { %2132 = vmatprep.subr.bf16.mxu0 %v3183_v7  ;;  %v3214_v7 = vld [vmem:[#allocation10 + $0xb0] ss:$8 sps:$4 sm:$0xff]  }
 0x163   :  { %v270_v24 = vpop.f32.mrb[0].mxu0 }
 0x164   :  { %v271_v25 = vadd.f32 %v270_v24, %v149_v22  ;;  %v272_v26 = vpop.f32.mrb[1].mxu0 }
 0x165   :  { %v273_v27 = vadd.f32 %v272_v26, %v153_v23  ;;  %v274_v28 = vpop.f32.mrb[2].mxu0  ;;  %v3117_v23 = vld [vmem:[#allocation8 + $0x8] ss:$28 sps:$4 sm:$0xff]  }
 0x166   :  { %v277_v29 = vmax.f32 %v271_v25, 0.0  ;;  %v275_v30 = vpop.f32.mrb[3].mxu0  ;;  %v3122_v25 = vld [vmem:[#allocation8 + $0x44] ss:$28 sps:$4 sm:$0xff]  }
 0x167   :  { %v278_v31 = vmax.f32 %v273_v27, 0.0  ;;  %v3181_v26 = vld [vmem:[#allocation10] ss:$8 sps:$4 sm:$0xff]   ;;  %v3186_v27 = vld [vmem:[#allocation10 + $0x14] ss:$8 sps:$4 sm:$0xff]  }
 0x168   :  { %v279_v34 = vpack.c.bf16 %v277_v29, %v277_v29  ;;  %v3120_v28 = vld [vmem:[#allocation8 + $0x40] ss:$28 sps:$4 sm:$0xff]   ;;  %v3184_v30 = vld [vmem:[#allocation10 + $0x10] ss:$8 sps:$4 sm:$0xff]  }
 0x169   :  { %v280_v32 = vpack.c.bf16 %v278_v31, %v278_v31  ;;  %v3125_v29 = vld [vmem:[#allocation8 + $0x7c] ss:$28 sps:$4 sm:$0xff]   ;;  %v3189_v31 = vld [vmem:[#allocation10 + $0x24] ss:$8 sps:$4 sm:$0xff]  }
 0x16b   :  { %517 = vmatprep.mubr.bf16.mxu1 %v280_v32  ;;  %v3123_v32 = vld [vmem:[#allocation8 + $0x78] ss:$28 sps:$4 sm:$0xff]  }
 0x16c   :  { %518 = vmatmul.mubr.bf16.vlgmr.msra.gmra.mrb[0].mxu1 %v279_v34  ;;  %v3187_v34 = vld [vmem:[#allocation10 + $0x20] ss:$8 sps:$4 sm:$0xff]  }
 0x16d   :  { %1272 = vmatpush1.bf16.msra.mxu1 %v3021_v33  ;;  %v3128_v33 = vld [vmem:[#allocation8 + $0xb4] ss:$28 sps:$4 sm:$0xff]  }
 0x16e   :  { %1273 = vmatprep.subr.bf16.mxu1 %v3029_v35  ;;  %v3192_v35 = vld [vmem:[#allocation10 + $0x34] ss:$8 sps:$4 sm:$0xff]  }
 0x171   :  { %1274 = vmatpush1.bf16.msra.mxu1 %v3027_v36  ;;  %v3126_v36 = vld [vmem:[#allocation8 + $0xb0] ss:$28 sps:$4 sm:$0xff]  }
 0x172   :  { %1275 = vmatprep.subr.bf16.mxu1 %v3035_v37  ;;  %v3131_v37 = vld [vmem:[#allocation8 + $0xec] ss:$28 sps:$4 sm:$0xff]  }
 0x175   :  { %1276 = vmatpush1.bf16.msra.mxu1 %v3033_v38  ;;  %v3190_v38 = vld [vmem:[#allocation10 + $0x30] ss:$8 sps:$4 sm:$0xff]  }
 0x176   :  { %1277 = vmatprep.subr.bf16.mxu1 %v3041_v39  ;;  %v3195_v39 = vld [vmem:[#allocation10 + $0x44] ss:$8 sps:$4 sm:$0xff]  }
 0x179   :  { %1278 = vmatpush1.bf16.msra.mxu1 %v3039_v40  ;;  %v3129_v40 = vld [vmem:[#allocation8 + $0xe8] ss:$28 sps:$4 sm:$0xff]  }
 0x17a   :  { %1279 = vmatprep.subr.bf16.mxu1 %v3047_v41  ;;  %v3134_v41 = vld [vmem:[#allocation8 + $0x124] ss:$28 sps:$4 sm:$0xff]  }
 0x17d   :  { %1280 = vmatpush1.bf16.msra.mxu1 %v3045_v42  ;;  %v3193_v42 = vld [vmem:[#allocation10 + $0x40] ss:$8 sps:$4 sm:$0xff]  }
 0x17e   :  { %1281 = vmatprep.subr.bf16.mxu1 %v3053_v43  ;;  %v3198_v43 = vld [vmem:[#allocation10 + $0x54] ss:$8 sps:$4 sm:$0xff]  }
 0x181   :  { %1282 = vmatpush1.bf16.msra.mxu1 %v3051_v44  ;;  %v3132_v44 = vld [vmem:[#allocation8 + $0x120] ss:$28 sps:$4 sm:$0xff]  }
 0x182   :  { %1283 = vmatprep.subr.bf16.mxu1 %v3059_v45  ;;  %v3137_v45 = vld [vmem:[#allocation8 + $0x15c] ss:$28 sps:$4 sm:$0xff]  }
 0x185   :  { %1284 = vmatpush1.bf16.msra.mxu1 %v3057_v46  ;;  %v3196_v46 = vld [vmem:[#allocation10 + $0x50] ss:$8 sps:$4 sm:$0xff]  }
 0x186   :  { %1285 = vmatprep.subr.bf16.mxu1 %v3065_v47  ;;  %v3201_v47 = vld [vmem:[#allocation10 + $0x64] ss:$8 sps:$4 sm:$0xff]  }
 0x189   :  { %1286 = vmatpush1.bf16.msra.mxu1 %v3063_v48  ;;  %v3135_v48 = vld [vmem:[#allocation8 + $0x158] ss:$28 sps:$4 sm:$0xff]  }
 0x18a   :  { %1287 = vmatprep.subr.bf16.mxu1 %v3071_v49  ;;  %v3140_v49 = vld [vmem:[#allocation8 + $0x194] ss:$28 sps:$4 sm:$0xff]  }
 0x18d   :  { %1288 = vmatpush1.bf16.msra.mxu1 %v3069_v50  ;;  %v3199_v50 = vld [vmem:[#allocation10 + $0x60] ss:$8 sps:$4 sm:$0xff]  }
 0x18e   :  { %1289 = vmatprep.subr.bf16.mxu1 %v3077_v51  ;;  %v3204_v51 = vld [vmem:[#allocation10 + $0x74] ss:$8 sps:$4 sm:$0xff]  }
 0x191   :  { %1290 = vmatpush1.bf16.msra.mxu1 %v3075_v52  ;;  %v3138_v52 = vld [vmem:[#allocation8 + $0x190] ss:$28 sps:$4 sm:$0xff]  }
 0x192   :  { %1291 = vmatprep.subr.bf16.mxu1 %v3083_v53  ;;  %v3143_v53 = vld [vmem:[#allocation8 + $0x1cc] ss:$28 sps:$4 sm:$0xff]  }
 0x195   :  { %1292 = vmatpush1.bf16.msra.mxu1 %v3081_v54  ;;  %v3202_v54 = vld [vmem:[#allocation10 + $0x70] ss:$8 sps:$4 sm:$0xff]  }
 0x196   :  { %1293 = vmatprep.subr.bf16.mxu1 %v3089_v55  ;;  %v3207_v55 = vld [vmem:[#allocation10 + $0x84] ss:$8 sps:$4 sm:$0xff]  }
 0x199   :  { %1294 = vmatpush1.bf16.msra.mxu1 %v3087_v56  ;;  %v3141_v56 = vld [vmem:[#allocation8 + $0x1c8] ss:$28 sps:$4 sm:$0xff]  }
 0x19a   :  { %1295 = vmatprep.subr.bf16.mxu1 %v3095_v57  ;;  %v3146_v57 = vld [vmem:[#allocation8 + $0x204] ss:$28 sps:$4 sm:$0xff]  }
 0x19d   :  { %1296 = vmatpush1.bf16.msra.mxu1 %v3093_v58  ;;  %v3205_v58 = vld [vmem:[#allocation10 + $0x80] ss:$8 sps:$4 sm:$0xff]  }
 0x19e   :  { %1297 = vmatprep.subr.bf16.mxu1 %v3101_v59  ;;  %v3210_v59 = vld [vmem:[#allocation10 + $0x94] ss:$8 sps:$4 sm:$0xff]  }
 0x1a1   :  { %1298 = vmatpush1.bf16.msra.mxu1 %v3099_v60  ;;  %v3144_v60 = vld [vmem:[#allocation8 + $0x200] ss:$28 sps:$4 sm:$0xff]  }
 0x1a2   :  { %1299 = vmatprep.subr.bf16.mxu1 %v3107_v61  ;;  %v3149_v61 = vld [vmem:[#allocation8 + $0x23c] ss:$28 sps:$4 sm:$0xff]  }
 0x1a5   :  { %1300 = vmatpush1.bf16.msra.mxu1 %v3105_v62  ;;  %v3208_v62 = vld [vmem:[#allocation10 + $0x90] ss:$8 sps:$4 sm:$0xff]  }
 0x1a6   :  { %1301 = vmatprep.subr.bf16.mxu1 %v3113_v2  ;;  %v3152_v2 = vld [vmem:[#allocation8 + $0x274] ss:$28 sps:$4 sm:$0xff]  }
 0x1a9   :  { %1302 = vmatpush1.bf16.msra.mxu1 %v3111_v3  ;;  %v3211_v3 = vld [vmem:[#allocation10 + $0xa0] ss:$8 sps:$4 sm:$0xff]  }
 0x1aa   :  { %1312 = vmatprep.subr.bf16.mxu1 %v3119_v6  ;;  %v3155_v6 = vld [vmem:[#allocation8 + $0x2ac] ss:$28 sps:$4 sm:$0xff]  }
 0x23f   :  { %v519_v11 = vpop.f32.mrb[0].mxu1 }
 0x240   :  { %v520_v12 = vadd.f32 %v519_v11, %v318_v9  ;;  %v521_v13 = vpop.f32.mrb[1].mxu1  ;;  %v3158_v9 = vld [vmem:[#allocation8 + $0x2e4] ss:$28 sps:$4 sm:$0xff]   ;;  %v3161_v11 = vld [vmem:[#allocation8 + $0x31c] ss:$28 sps:$4 sm:$0xff]  }
 0x241   :  { %v522_v14 = vadd.f32 %v521_v13, %v322_v10  ;;  %v523_v15 = vpop.f32.mrb[2].mxu1  ;;  %v3156_v10 = vld [vmem:[#allocation8 + $0x2e0] ss:$28 sps:$4 sm:$0xff]   ;;  %v3164_v13 = vld [vmem:[#allocation8 + $0x354] ss:$28 sps:$4 sm:$0xff]  }
 0x242   :  { %v526_v16 = vmax.f32 %v520_v12, 0.0  ;;  %v524_v17 = vpop.f32.mrb[3].mxu1  ;;  %v3159_v12 = vld [vmem:[#allocation8 + $0x318] ss:$28 sps:$4 sm:$0xff]  }
 0x243   :  { %v527_v20 = vmax.f32 %v522_v14, 0.0  ;;  %v3162_v14 = vld [vmem:[#allocation8 + $0x350] ss:$28 sps:$4 sm:$0xff]   ;;  %v3165_v15 = vld [vmem:[#allocation8 + $0x1d8] ss:$28 sps:$4 sm:$0xff]  }
 0x244   :  { %v3758_v24 = vpack.c.bf16 %v526_v16, %v526_v16  ;;  %v3166_v16 = vld [vmem:[#allocation8 + $0x18] ss:$28 sps:$4 sm:$0xff]   ;;  %v3167_v17 = vld [vmem:[#allocation8 + $0x210] ss:$28 sps:$4 sm:$0xff]  }
 0x245   :  { %v3756_v22 = vpack.c.bf16 %v527_v20, %v527_v20  ;;  %v3168_v20 = vld [vmem:[#allocation8 + $0x50] ss:$28 sps:$4 sm:$0xff]  }
 0x247   :  { %1303 = vmatprep.mubr.bf16.mxu1 %v3756_v22  ;;  %1385 = vmatprep.mubr.bf16.mxu0 %v3756_v22 }
 0x248   :  { %1304 = vmatmul.mubr.bf16.vlgmr.msra.gmra.mrb[4].mxu1 %v3758_v24  ;;  %1386 = vmatmul.mubr.bf16.vlgmr.msra.gmra.mrb[4].mxu0 %v3758_v24 }
 0x249   :  { %1313 = vmatpush1.bf16.msra.mxu1 %v3117_v23  ;;  %1344 = vmatprep.mubr.bf16.mxu1 %v3756_v22  ;;  %v3169_v23 = vld [vmem:[#allocation8 + $0x248] ss:$28 sps:$4 sm:$0xff]  }
 0x24a   :  { %1314 = vmatprep.subr.bf16.mxu1 %v3122_v25  ;;  %2133 = vmatpush1.bf16.msra.mxu0 %v3181_v26  ;;  %v3170_v25 = vld [vmem:[#allocation8 + $0x88] ss:$28 sps:$4 sm:$0xff]   ;;  %v3171_v26 = vld [vmem:[#allocation8 + $0x280] ss:$28 sps:$4 sm:$0xff]  }
 0x24b   :  { %2134 = vmatprep.subr.bf16.mxu0 %v3186_v27  ;;  %v3172_v27 = vld [vmem:[#allocation8 + $0xc0] ss:$28 sps:$4 sm:$0xff]  }
 0x24d   :  { %1315 = vmatpush1.bf16.msra.mxu1 %v3120_v28  ;;  %v3173_v28 = vld [vmem:[#allocation8 + $0x2b8] ss:$28 sps:$4 sm:$0xff]  }
 0x24e   :  { %1316 = vmatprep.subr.bf16.mxu1 %v3125_v29  ;;  %2135 = vmatpush1.bf16.msra.mxu0 %v3184_v30  ;;  %v3174_v29 = vld [vmem:[#allocation8 + $0xf8] ss:$28 sps:$4 sm:$0xff]   ;;  %v3175_v30 = vld [vmem:[#allocation8 + $0x2f0] ss:$28 sps:$4 sm:$0xff]  }
 0x24f   :  { %2136 = vmatprep.subr.bf16.mxu0 %v3189_v31  ;;  %v3176_v31 = vld [vmem:[#allocation8 + $0x130] ss:$28 sps:$4 sm:$0xff]  }
 0x251   :  { %1317 = vmatpush1.bf16.msra.mxu1 %v3123_v32  ;;  %v3177_v32 = vld [vmem:[#allocation8 + $0x328] ss:$28 sps:$4 sm:$0xff]  }
 0x252   :  { %1318 = vmatprep.subr.bf16.mxu1 %v3128_v33  ;;  %2137 = vmatpush1.bf16.msra.mxu0 %v3187_v34  ;;  %v3178_v33 = vld [vmem:[#allocation8 + $0x168] ss:$28 sps:$4 sm:$0xff]  }
 0x253   :  { %2138 = vmatprep.subr.bf16.mxu0 %v3192_v35  ;;  %v3217_v34 = vld [vmem:[#allocation10 + $0xc0] ss:$8 sps:$4 sm:$0xff]  }
 0x254   :  { %v3179_v35 = vld [vmem:[#allocation8 + $0x360] ss:$28 sps:$4 sm:$0xff]  }
 0x255   :  { %1319 = vmatpush1.bf16.msra.mxu1 %v3126_v36  ;;  %v3222_v36 = vld [vmem:[#allocation10 + $0xd4] ss:$8 sps:$4 sm:$0xff]  }
 0x256   :  { %1320 = vmatprep.subr.bf16.mxu1 %v3131_v37  ;;  %2139 = vmatpush1.bf16.msra.mxu0 %v3190_v38  ;;  %v3180_v37 = vld [vmem:[#allocation8 + $0x1a0] ss:$28 sps:$4 sm:$0xff]   ;;  %v3220_v38 = vld [vmem:[#allocation10 + $0xd0] ss:$8 sps:$4 sm:$0xff]  }
 0x257   :  { %2140 = vmatprep.subr.bf16.mxu0 %v3195_v39  ;;  %v3225_v39 = vld [vmem:[#allocation10 + $0xe4] ss:$8 sps:$4 sm:$0xff]  }
 0x259   :  { %1321 = vmatpush1.bf16.msra.mxu1 %v3129_v40  ;;  %v3223_v40 = vld [vmem:[#allocation10 + $0xe0] ss:$8 sps:$4 sm:$0xff]  }
 0x25a   :  { %1322 = vmatprep.subr.bf16.mxu1 %v3134_v41  ;;  %2141 = vmatpush1.bf16.msra.mxu0 %v3193_v42  ;;  %v3228_v41 = vld [vmem:[#allocation10 + $0xf4] ss:$8 sps:$4 sm:$0xff]   ;;  %v3226_v42 = vld [vmem:[#allocation10 + $0xf0] ss:$8 sps:$4 sm:$0xff]  }
 0x25b   :  { %2142 = vmatprep.subr.bf16.mxu0 %v3198_v43  ;;  %v3231_v43 = vld [vmem:[#allocation10 + $0x104] ss:$8 sps:$4 sm:$0xff]  }
 0x25d   :  { %1323 = vmatpush1.bf16.msra.mxu1 %v3132_v44  ;;  %v3771_v44 = vld [vmem:[%s3821_s6] sm:$0xff] }
 0x25e   :  { %1324 = vmatprep.subr.bf16.mxu1 %v3137_v45  ;;  %2143 = vmatpush1.bf16.msra.mxu0 %v3196_v46  ;;  %v663_v45 = vrot.slane %v3771_v44, %v3741_v19  ;;  %v667_v46 = vrot.slane %v3771_v44, %v3747_v21 }
 0x25f   :  { %2144 = vmatprep.subr.bf16.mxu0 %v3201_v47 }
 0x261   :  { %1325 = vmatpush1.bf16.msra.mxu1 %v3135_v48 }
 0x262   :  { %1326 = vmatprep.subr.bf16.mxu1 %v3140_v49  ;;  %2145 = vmatpush1.bf16.msra.mxu0 %v3199_v50 }
 0x263   :  { %2146 = vmatprep.subr.bf16.mxu0 %v3204_v51 }
 0x265   :  { %1327 = vmatpush1.bf16.msra.mxu1 %v3138_v52 }
 0x266   :  { %1328 = vmatprep.subr.bf16.mxu1 %v3143_v53  ;;  %2147 = vmatpush1.bf16.msra.mxu0 %v3202_v54 }
 0x267   :  { %2148 = vmatprep.subr.bf16.mxu0 %v3207_v55 }
 0x269   :  { %1329 = vmatpush1.bf16.msra.mxu1 %v3141_v56 }
 0x26a   :  { %1330 = vmatprep.subr.bf16.mxu1 %v3146_v57  ;;  %2149 = vmatpush1.bf16.msra.mxu0 %v3205_v58 }
 0x26b   :  { %2150 = vmatprep.subr.bf16.mxu0 %v3210_v59  ;;  %v3229_v59 = vld [vmem:[#allocation10 + $0x100] ss:$8 sps:$4 sm:$0xff]  }
 0x26d   :  { %1331 = vmatpush1.bf16.msra.mxu1 %v3144_v60 }
 0x26e   :  { %1332 = vmatprep.subr.bf16.mxu1 %v3149_v61  ;;  %2151 = vmatpush1.bf16.msra.mxu0 %v3208_v62  ;;  %v3234_v61 = vld [vmem:[#allocation10 + $0x114] ss:$8 sps:$4 sm:$0xff]   ;;  %v3232_v62 = vld [vmem:[#allocation10 + $0x110] ss:$8 sps:$4 sm:$0xff]  }
 0x26f   :  { %2152 = vmatprep.subr.bf16.mxu0 %v3213_v63  ;;  %v3237_v63 = vld [vmem:[#allocation10 + $0x124] ss:$8 sps:$4 sm:$0xff]  }
 0x271   :  { %1333 = vmatpush1.bf16.msra.mxu1 %v3147_v0  ;;  %v3235_v0 = vld [vmem:[#allocation10 + $0x120] ss:$8 sps:$4 sm:$0xff]  }
 0x272   :  { %1334 = vmatprep.subr.bf16.mxu1 %v3152_v2  ;;  %2153 = vmatpush1.bf16.msra.mxu0 %v3211_v3  ;;  %v3240_v2 = vld [vmem:[#allocation10 + $0x134] ss:$8 sps:$4 sm:$0xff]   ;;  %v3238_v3 = vld [vmem:[#allocation10 + $0x130] ss:$8 sps:$4 sm:$0xff]  }
 0x273   :  { %2154 = vmatprep.subr.bf16.mxu0 %v3216_v4  ;;  %v3243_v4 = vld [vmem:[#allocation10 + $0x144] ss:$8 sps:$4 sm:$0xff]  }
 0x275   :  { %1335 = vmatpush1.bf16.msra.mxu1 %v3150_v5  ;;  %v3241_v5 = vld [vmem:[#allocation10 + $0x140] ss:$8 sps:$4 sm:$0xff]  }
 0x276   :  { %1336 = vmatprep.subr.bf16.mxu1 %v3155_v6  ;;  %2155 = vmatpush1.bf16.msra.mxu0 %v3214_v7  ;;  %v3246_v6 = vld [vmem:[#allocation10 + $0x154] ss:$8 sps:$4 sm:$0xff]   ;;  %v3244_v7 = vld [vmem:[#allocation10 + $0x150] ss:$8 sps:$4 sm:$0xff]  }
 0x279   :  { %1337 = vmatpush1.bf16.msra.mxu1 %v3153_v8  ;;  %v3249_v8 = vld [vmem:[#allocation10 + $0x164] ss:$8 sps:$4 sm:$0xff]  }
 0x27a   :  { %1338 = vmatprep.subr.bf16.mxu1 %v3158_v9  ;;  %v3247_v9 = vld [vmem:[#allocation10 + $0x160] ss:$8 sps:$4 sm:$0xff]  }
 0x27d   :  { %1339 = vmatpush1.bf16.msra.mxu1 %v3156_v10  ;;  %v3252_v10 = vld [vmem:[#allocation10 + $0x174] ss:$8 sps:$4 sm:$0xff]  }
 0x27e   :  { %1340 = vmatprep.subr.bf16.mxu1 %v3161_v11  ;;  %v3250_v11 = vld [vmem:[#allocation10 + $0x170] ss:$8 sps:$4 sm:$0xff]  }
 0x281   :  { %1341 = vmatpush1.bf16.msra.mxu1 %v3159_v12  ;;  %v3255_v12 = vld [vmem:[#allocation10 + $0x184] ss:$8 sps:$4 sm:$0xff]  }
 0x282   :  { %1342 = vmatprep.subr.bf16.mxu1 %v3164_v13  ;;  %v3253_v13 = vld [vmem:[#allocation10 + $0x180] ss:$8 sps:$4 sm:$0xff]  }
 0x285   :  { %1343 = vmatpush1.bf16.msra.mxu1 %v3162_v14  ;;  %v3258_v14 = vld [vmem:[#allocation10 + $0x194] ss:$8 sps:$4 sm:$0xff]  }
 0x286   :  { %2902 = vmatprep.subr.bf16.mxu1 %v3165_v15  ;;  %v3349_v15 = vld [vmem:[#allocation11] ss:$8 sps:$4 sm:$0xff]  }
 0x288   :  { %1345 = vmatmul.mubr.bf16.vlgmr.msra.gmra.mrb[8].mxu1 %v3758_v24 }
 0x289   :  { %2903 = vmatpush3.bf16.msra.mxu1 %v3166_v16  ;;  %1426 = vmatprep.mubr.bf16.mxu1 %v3756_v22  ;;  %v3219_v22 = vld [vmem:[#allocation10 + $0xc4] ss:$8 sps:$4 sm:$0xff]  }
 0x28a   :  { %2904 = vmatprep.subr.bf16.mxu1 %v3167_v17  ;;  %2156 = vmatprep.subr.bf16.mxu0 %v3219_v22  ;;  %v3351_v16 = vld [vmem:[#allocation11 + $0x4] ss:$8 sps:$4 sm:$0xff]   ;;  %v3256_v17 = vld [vmem:[#allocation10 + $0x190] ss:$8 sps:$4 sm:$0xff]   ;;  %v3360_v22 = vld [vmem:[#allocation11 + $0x34] ss:$8 sps:$4 sm:$0xff]  }
 0x28b   :  { %2157 = vmatpush1.bf16.msra.mxu0 %v3217_v34 }
 0x28c   :  { %2158 = vmatprep.subr.bf16.mxu0 %v3222_v36  ;;  %v3267_v36 = vld [vmem:[#allocation10 + $0x1c4] ss:$8 sps:$4 sm:$0xff]  }
 0x28d   :  { %2905 = vmatpush3.bf16.msra.mxu1 %v3168_v20  ;;  %v3354_v20 = vld [vmem:[#allocation11 + $0x14] ss:$8 sps:$4 sm:$0xff]  }
 0x28e   :  { %2906 = vmatprep.subr.bf16.mxu1 %v3169_v23  ;;  %v3261_v23 = vld [vmem:[#allocation10 + $0x1a4] ss:$8 sps:$4 sm:$0xff]  }
 0x28f   :  { %2159 = vmatpush1.bf16.msra.mxu0 %v3220_v38  ;;  %v3358_v38 = vld [vmem:[#allocation11 + $0x30] ss:$8 sps:$4 sm:$0xff]  }
 0x290   :  { %2160 = vmatprep.subr.bf16.mxu0 %v3225_v39  ;;  %v3363_v39 = vld [vmem:[#allocation11 + $0x44] ss:$8 sps:$4 sm:$0xff]  }
 0x291   :  { %2907 = vmatpush3.bf16.msra.mxu1 %v3170_v25  ;;  %v3352_v25 = vld [vmem:[#allocation11 + $0x10] ss:$8 sps:$4 sm:$0xff]  }
 0x292   :  { %2908 = vmatprep.subr.bf16.mxu1 %v3171_v26  ;;  %v3357_v26 = vld [vmem:[#allocation11 + $0x24] ss:$8 sps:$4 sm:$0xff]  }
 0x293   :  { %2161 = vmatpush1.bf16.msra.mxu0 %v3223_v40 }
 0x294   :  { %2162 = vmatprep.subr.bf16.mxu0 %v3228_v41  ;;  %v3265_v41 = vld [vmem:[#allocation10 + $0x1c0] ss:$8 sps:$4 sm:$0xff]  }
 0x295   :  { %2909 = vmatpush3.bf16.msra.mxu1 %v3172_v27  ;;  %v3259_v27 = vld [vmem:[#allocation10 + $0x1a0] ss:$8 sps:$4 sm:$0xff]  }
 0x296   :  { %2910 = vmatprep.subr.bf16.mxu1 %v3173_v28  ;;  %v682_v28 = vsub.s32 5, %v3738_v18 }
 0x297   :  { %2163 = vmatpush1.bf16.msra.mxu0 %v3226_v42 }
 0x298   :  { %2173 = vmatprep.subr.bf16.mxu0 %v3231_v43  ;;  %v683_v34 = vrot.slane %v3771_v44, %v682_v28 }
 0x299   :  { %2911 = vmatpush3.bf16.msra.mxu1 %v3174_v29  ;;  %v3264_v29 = vld [vmem:[#allocation10 + $0x1b4] ss:$8 sps:$4 sm:$0xff]  }
 0x29a   :  { %2912 = vmatprep.subr.bf16.mxu1 %v3175_v30  ;;  %v670_v30 = vsub.s32 2, %v3738_v18 }
 0x29d   :  { %2913 = vmatpush3.bf16.msra.mxu1 %v3176_v31  ;;  %v674_v31 = vsub.s32 3, %v3738_v18 }
 0x29e   :  { %2914 = vmatprep.subr.bf16.mxu1 %v3177_v32  ;;  %v3355_v32 = vld [vmem:[#allocation11 + $0x20] ss:$8 sps:$4 sm:$0xff]  }
 0x2a1   :  { %2915 = vmatpush3.bf16.msra.mxu1 %v3178_v33  ;;  %v3262_v33 = vld [vmem:[#allocation10 + $0x1b0] ss:$8 sps:$4 sm:$0xff]  }
 0x2a2   :  { %2916 = vmatprep.subr.bf16.mxu1 %v3179_v35  ;;  %v671_v35 = vrot.slane %v3771_v44, %v670_v30 }
 0x2a5   :  { %2917 = vmatpush3.bf16.msra.mxu1 %v3180_v37  ;;  %v675_v37 = vrot.slane %v3771_v44, %v674_v31  ;;  %v3294_v31 = vld [vmem:[#allocation10 + $0x254] ss:$8 sps:$4 sm:$0xff]  }
 0x2a6   :  { %2508 = vmatprep.subr.bf16.mxu1 %v3351_v16  ;;  %v3288_v16 = vld [vmem:[#allocation10 + $0x234] ss:$8 sps:$4 sm:$0xff]  }
 0x2a8   :  { %1427 = vmatmul.mubr.bf16.vlgmr.msra.gmra.mrb[12].mxu1 %v3758_v24 }
 0x2a9   :  { %2509 = vmatpush1.bf16.msra.mxu1 %v3349_v15  ;;  %v3283_v15 = vld [vmem:[#allocation10 + $0x220] ss:$8 sps:$4 sm:$0xff]  }
 0x2aa   :  { %2510 = vmatprep.subr.bf16.mxu1 %v3354_v20  ;;  %v3384_v20 = vld [vmem:[#allocation11 + $0xb4] ss:$8 sps:$4 sm:$0xff]  }
 0x2ad   :  { %2511 = vmatpush1.bf16.msra.mxu1 %v3352_v25  ;;  %v3291_v25 = vld [vmem:[#allocation10 + $0x244] ss:$8 sps:$4 sm:$0xff]  }
 0x2ae   :  { %2512 = vmatprep.subr.bf16.mxu1 %v3357_v26  ;;  %v3382_v26 = vld [vmem:[#allocation11 + $0xb0] ss:$8 sps:$4 sm:$0xff]  }
 0x2b1   :  { %2513 = vmatpush1.bf16.msra.mxu1 %v3355_v32 }
 0x2b2   :  { %2514 = vmatprep.subr.bf16.mxu1 %v3360_v22 }
 0x2b5   :  { %2515 = vmatpush1.bf16.msra.mxu1 %v3358_v38  ;;  %v3388_v38 = vld [vmem:[#allocation11 + $0xd0] ss:$8 sps:$4 sm:$0xff]  }
 0x2b6   :  { %2516 = vmatprep.subr.bf16.mxu1 %v3363_v39  ;;  %v3295_v39 = vld [vmem:[#allocation10 + $0x260] ss:$8 sps:$4 sm:$0xff]  }
 0x31b   :  { %v1305_v47 = vpop.f32.mrb[4].mxu1  ;;  %v3777_v48 = vpop.f32.mrb[4].mxu0 }
 0x31c   :  { %v1306_v24 = vadd.f32 %v1305_v47, %v663_v45  ;;  %v1307_v49 = vpop.f32.mrb[5].mxu1  ;;  %v3779_v50 = vpop.f32.mrb[5].mxu0 }
 0x31d   :  { %v1308_v51 = vadd.f32 %v1307_v49, %v667_v46  ;;  %v1309_v52 = vpop.f32.mrb[6].mxu1  ;;  %v1391_v53 = vpop.f32.mrb[6].mxu0  ;;  %v1390_v42 = vadd.f32 %v3779_v50, %v683_v34  ;;  %v3270_v46 = vld [vmem:[#allocation10 + $0x1d4] ss:$8 sps:$4 sm:$0xff]   ;;  %v3361_v49 = vld [vmem:[#allocation11 + $0x40] ss:$8 sps:$4 sm:$0xff]  }
 0x31e   :  { %v1310_v54 = vpop.f32.mrb[7].mxu1  ;;  %v1392_v55 = vpop.f32.mrb[7].mxu0  ;;  %3397 = vtanh.f32 %v1306_v24  ;;  %v3366_v52 = vld [vmem:[#allocation11 + $0x54] ss:$8 sps:$4 sm:$0xff]   ;;  %v3268_v53 = vld [vmem:[#allocation10 + $0x1d0] ss:$8 sps:$4 sm:$0xff]   ;;  %2517 = vmatpush1.bf16.msra.mxu1 %v3361_v49 }
 0x31f   :  { %3399 = vtanh.f32 %v1308_v51  ;;  %v3273_v54 = vld [vmem:[#allocation10 + $0x1e4] ss:$8 sps:$4 sm:$0xff]   ;;  %v3364_v50 = vld [vmem:[#allocation11 + $0x50] ss:$8 sps:$4 sm:$0xff]   ;;  %2518 = vmatprep.subr.bf16.mxu1 %v3366_v52  ;;  %v3307_v49 = vld [vmem:[#allocation10 + $0x2a0] ss:$8 sps:$4 sm:$0xff]  }
 0x320   :  { %v3369_v55 = vld [vmem:[#allocation11 + $0x64] ss:$8 sps:$4 sm:$0xff]  }
 0x322   :  { %2519 = vmatpush1.bf16.msra.mxu1 %v3364_v50 }
 0x323   :  { %2520 = vmatprep.subr.bf16.mxu1 %v3369_v55  ;;  %v3313_v55 = vld [vmem:[#allocation10 + $0x2c0] ss:$8 sps:$4 sm:$0xff]  }
 0x328   :  { %v3398_v56 = vpop.eup %3397 }
 0x329   :  { %v3400_v57 = vpop.eup %3399  ;;  %v1441_v60 = vpack.c.bf16 %v3398_v56, %v3398_v56  ;;  %v3271_v56 = vld [vmem:[#allocation10 + $0x1e0] ss:$8 sps:$4 sm:$0xff]  }
 0x32a   :  { %v1442_v58 = vpack.c.bf16 %v3400_v57, %v3400_v57  ;;  %v3276_v57 = vld [vmem:[#allocation10 + $0x1f4] ss:$8 sps:$4 sm:$0xff]  }
 0x32c   :  { %2164 = vmatprep.mubr.bf16.mxu0 %v1442_v58  ;;  %v3367_v58 = vld [vmem:[#allocation11 + $0x60] ss:$8 sps:$4 sm:$0xff]  }
 0x32d   :  { %2165 = vmatmul.mubr.bf16.vlgmr.msra.gmra.mrb[8].mxu0 %v1441_v60  ;;  %v3274_v60 = vld [vmem:[#allocation10 + $0x1f0] ss:$8 sps:$4 sm:$0xff]   ;;  %2521 = vmatpush1.bf16.msra.mxu1 %v3367_v58  ;;  %v3321_v58 = vld [vmem:[#allocation10 + $0x2e4] ss:$8 sps:$4 sm:$0xff]  }
 0x32e   :  { %2174 = vmatpush1.bf16.msra.mxu0 %v3229_v59  ;;  %v3372_v59 = vld [vmem:[#allocation11 + $0x74] ss:$8 sps:$4 sm:$0xff]  }
 0x32f   :  { %2175 = vmatprep.subr.bf16.mxu0 %v3234_v61  ;;  %2522 = vmatprep.subr.bf16.mxu1 %v3372_v59  ;;  %v3319_v59 = vld [vmem:[#allocation10 + $0x2e0] ss:$8 sps:$4 sm:$0xff]  }
 0x332   :  { %2176 = vmatpush1.bf16.msra.mxu0 %v3232_v62  ;;  %v3279_v62 = vld [vmem:[#allocation10 + $0x204] ss:$8 sps:$4 sm:$0xff]  }
 0x333   :  { %2177 = vmatprep.subr.bf16.mxu0 %v3237_v63 }
 0x336   :  { %2178 = vmatpush1.bf16.msra.mxu0 %v3235_v0  ;;  %v3370_v0 = vld [vmem:[#allocation11 + $0x70] ss:$8 sps:$4 sm:$0xff]  }
 0x337   :  { %2179 = vmatprep.subr.bf16.mxu0 %v3240_v2  ;;  %2523 = vmatpush1.bf16.msra.mxu1 %v3370_v0 }
 0x33a   :  { %2180 = vmatpush1.bf16.msra.mxu0 %v3238_v3 }
 0x33b   :  { %2181 = vmatprep.subr.bf16.mxu0 %v3243_v4  ;;  %v3375_v4 = vld [vmem:[#allocation11 + $0x84] ss:$8 sps:$4 sm:$0xff]  }
 0x33c   :  { %2524 = vmatprep.subr.bf16.mxu1 %v3375_v4  ;;  %v3333_v4 = vld [vmem:[#allocation10 + $0x324] ss:$8 sps:$4 sm:$0xff]  }
 0x33e   :  { %2182 = vmatpush1.bf16.msra.mxu0 %v3241_v5  ;;  %v3277_v5 = vld [vmem:[#allocation10 + $0x200] ss:$8 sps:$4 sm:$0xff]  }
 0x33f   :  { %2183 = vmatprep.subr.bf16.mxu0 %v3246_v6 }
 0x342   :  { %2184 = vmatpush1.bf16.msra.mxu0 %v3244_v7  ;;  %v3282_v7 = vld [vmem:[#allocation10 + $0x214] ss:$8 sps:$4 sm:$0xff]  }
 0x343   :  { %2185 = vmatprep.subr.bf16.mxu0 %v3249_v8 }
 0x346   :  { %2186 = vmatpush1.bf16.msra.mxu0 %v3247_v9  ;;  %v3373_v9 = vld [vmem:[#allocation11 + $0x80] ss:$8 sps:$4 sm:$0xff]  }
 0x347   :  { %2187 = vmatprep.subr.bf16.mxu0 %v3252_v10  ;;  %v3378_v10 = vld [vmem:[#allocation11 + $0x94] ss:$8 sps:$4 sm:$0xff]   ;;  %2525 = vmatpush1.bf16.msra.mxu1 %v3373_v9  ;;  %v3334_v9 = vld [vmem:[#allocation10 + $0x330] ss:$8 sps:$4 sm:$0xff]  }
 0x348   :  { %2526 = vmatprep.subr.bf16.mxu1 %v3378_v10  ;;  %v3339_v10 = vld [vmem:[#allocation10 + $0x344] ss:$8 sps:$4 sm:$0xff]  }
 0x34a   :  { %2188 = vmatpush1.bf16.msra.mxu0 %v3250_v11  ;;  %v3280_v11 = vld [vmem:[#allocation10 + $0x210] ss:$8 sps:$4 sm:$0xff]  }
 0x34b   :  { %2189 = vmatprep.subr.bf16.mxu0 %v3255_v12  ;;  %v3285_v12 = vld [vmem:[#allocation10 + $0x224] ss:$8 sps:$4 sm:$0xff]  }
 0x34e   :  { %2190 = vmatpush1.bf16.msra.mxu0 %v3253_v13  ;;  %v3376_v13 = vld [vmem:[#allocation11 + $0x90] ss:$8 sps:$4 sm:$0xff]  }
 0x34f   :  { %2191 = vmatprep.subr.bf16.mxu0 %v3258_v14  ;;  %v3381_v14 = vld [vmem:[#allocation11 + $0xa4] ss:$8 sps:$4 sm:$0xff]   ;;  %2527 = vmatpush1.bf16.msra.mxu1 %v3376_v13  ;;  %v3340_v13 = vld [vmem:[#allocation10 + $0x350] ss:$8 sps:$4 sm:$0xff]  }
 0x350   :  { %2528 = vmatprep.subr.bf16.mxu1 %v3381_v14  ;;  %v3343_v14 = vld [vmem:[#allocation10 + $0x360] ss:$8 sps:$4 sm:$0xff]  }
 0x352   :  { %2192 = vmatpush1.bf16.msra.mxu0 %v3256_v17  ;;  %v3379_v17 = vld [vmem:[#allocation11 + $0xa0] ss:$8 sps:$4 sm:$0xff]  }
 0x353   :  { %2193 = vmatprep.subr.bf16.mxu0 %v3261_v23  ;;  %v3286_v23 = vld [vmem:[#allocation10 + $0x230] ss:$8 sps:$4 sm:$0xff]   ;;  %2529 = vmatpush1.bf16.msra.mxu1 %v3379_v17 }
 0x354   :  { %2530 = vmatprep.subr.bf16.mxu1 %v3384_v20  ;;  %v3393_v20 = vld [vmem:[#allocation11 + $0xe4] ss:$8 sps:$4 sm:$0xff]  }
 0x356   :  { %2194 = vmatpush1.bf16.msra.mxu0 %v3259_v27  ;;  %v3387_v27 = vld [vmem:[#allocation11 + $0xc4] ss:$8 sps:$4 sm:$0xff]  }
 0x357   :  { %2195 = vmatprep.subr.bf16.mxu0 %v3264_v29  ;;  %v3289_v29 = vld [vmem:[#allocation10 + $0x240] ss:$8 sps:$4 sm:$0xff]   ;;  %2531 = vmatpush1.bf16.msra.mxu1 %v3382_v26  ;;  %v3394_v26 = vld [vmem:[#allocation11 + $0xf0] ss:$8 sps:$4 sm:$0xff]  }
 0x358   :  { %2532 = vmatprep.subr.bf16.mxu1 %v3387_v27  ;;  %v1560_v27 = vld [vmem:[%s3823_s8] sm:$0x3] }
 0x35a   :  { %2196 = vmatpush1.bf16.msra.mxu0 %v3262_v33  ;;  %v3385_v33 = vld [vmem:[#allocation11 + $0xc0] ss:$8 sps:$4 sm:$0xff]  }
 0x35b   :  { %v1346_v40 = vpop.f32.mrb[8].mxu1  ;;  %2197 = vmatprep.subr.bf16.mxu0 %v3267_v36  ;;  %v3292_v36 = vld [vmem:[#allocation10 + $0x250] ss:$8 sps:$4 sm:$0xff]   ;;  %2533 = vmatpush1.bf16.msra.mxu1 %v3385_v33 }
 0x35c   :  { %v1347_v43 = vadd.f32 %v1346_v40, %v671_v35  ;;  %v1348_v45 = vpop.f32.mrb[9].mxu1  ;;  %v3390_v35 = vld [vmem:[#allocation11 + $0xd4] ss:$8 sps:$4 sm:$0xff]  }
 0x35d   :  { %v1349_v47 = vadd.f32 %v1348_v45, %v675_v37  ;;  %v1350_v24 = vpop.f32.mrb[10].mxu1  ;;  %v3297_v37 = vld [vmem:[#allocation10 + $0x264] ss:$8 sps:$4 sm:$0xff]   ;;  %2534 = vmatprep.subr.bf16.mxu1 %v3390_v35  ;;  %v3300_v40 = vld [vmem:[#allocation10 + $0x274] ss:$8 sps:$4 sm:$0xff]  }
 0x35e   :  { %3401 = vtanh.f32 %v1347_v43  ;;  %v1351_v51 = vpop.f32.mrb[11].mxu1  ;;  %2198 = vmatpush1.bf16.msra.mxu0 %v3265_v41  ;;  %v3298_v41 = vld [vmem:[#allocation10 + $0x270] ss:$8 sps:$4 sm:$0xff]   ;;  %v3301_v43 = vld [vmem:[#allocation10 + $0x280] ss:$8 sps:$4 sm:$0xff]   ;;  %v678_v24 = vsub.s32 4, %v3738_v18 }
 0x35f   :  { %3403 = vtanh.f32 %v1349_v47  ;;  %2199 = vmatprep.subr.bf16.mxu0 %v3270_v46  ;;  %2535 = vmatpush1.bf16.msra.mxu1 %v3388_v38  ;;  %v3306_v45 = vld [vmem:[#allocation10 + $0x294] ss:$8 sps:$4 sm:$0xff]   ;;  %v3304_v46 = vld [vmem:[#allocation10 + $0x290] ss:$8 sps:$4 sm:$0xff]   ;;  %v3309_v47 = vld [vmem:[#allocation10 + $0x2a4] ss:$8 sps:$4 sm:$0xff]  }
 0x360   :  { %3405 = vtanh.f32 %v1390_v42  ;;  %v3303_v42 = vld [vmem:[#allocation10 + $0x284] ss:$8 sps:$4 sm:$0xff]   ;;  %v3312_v51 = vld [vmem:[#allocation10 + $0x2b4] ss:$8 sps:$4 sm:$0xff]   ;;  %v679_v52 = vrot.slane %v3771_v44, %v678_v24  ;;  %2536 = vmatprep.subr.bf16.mxu1 %v3393_v20 }
 0x362   :  { %2200 = vmatpush1.bf16.msra.mxu0 %v3268_v53  ;;  %v3310_v53 = vld [vmem:[#allocation10 + $0x2b0] ss:$8 sps:$4 sm:$0xff]   ;;  %v1388_v50 = vadd.f32 %v3777_v48, %v679_v52  ;;  %v3325_v48 = vld [vmem:[#allocation10 + $0x300] ss:$8 sps:$4 sm:$0xff]  }
 0x363   :  { %2201 = vmatprep.subr.bf16.mxu0 %v3273_v54  ;;  %v3315_v54 = vld [vmem:[#allocation10 + $0x2c4] ss:$8 sps:$4 sm:$0xff]  }
 0x364   :  { %3407 = vtanh.f32 %v1388_v50 }
 0x366   :  { %2202 = vmatpush1.bf16.msra.mxu0 %v3271_v56  ;;  %v3318_v56 = vld [vmem:[#allocation10 + $0x2d4] ss:$8 sps:$4 sm:$0xff]  }
 0x367   :  { %2203 = vmatprep.subr.bf16.mxu0 %v3276_v57  ;;  %v3316_v57 = vld [vmem:[#allocation10 + $0x2d0] ss:$8 sps:$4 sm:$0xff]  }
 0x368   :  { %v3402_v61 = vpop.eup %3401 }
 0x369   :  { %v3404_v63 = vpop.eup %3403  ;;  %v1443_v6 = vpack.c.bf16 %v3402_v61, %v3402_v61  ;;  %v3322_v61 = vld [vmem:[#allocation10 + $0x2f0] ss:$8 sps:$4 sm:$0xff]  }
 0x36a   :  { %v3406_v2 = vpop.eup %3405  ;;  %v1444_v3 = vpack.c.bf16 %v3404_v63, %v3404_v63  ;;  %2204 = vmatpush1.bf16.msra.mxu0 %v3274_v60  ;;  %v3324_v60 = vld [vmem:[#allocation10 + $0x2f4] ss:$8 sps:$4 sm:$0xff]  }
 0x36b   :  { %2214 = vmatprep.subr.bf16.mxu0 %v3279_v62  ;;  %v1446_v8 = vpack.c.bf16 %v3406_v2, %v3406_v2  ;;  %v3327_v62 = vld [vmem:[#allocation10 + $0x304] ss:$8 sps:$4 sm:$0xff]   ;;  %v3330_v2 = vld [vmem:[#allocation10 + $0x314] ss:$8 sps:$4 sm:$0xff]  }
 0x36c   :  { %2205 = vmatprep.mubr.bf16.mxu0 %v1444_v3  ;;  %v3328_v3 = vld [vmem:[#allocation10 + $0x310] ss:$8 sps:$4 sm:$0xff]  }
 0x36d   :  { %2206 = vmatmul.mubr.bf16.vlgmr.msra.gmra.mrb[8].mxu0 %v1443_v6  ;;  %v3331_v6 = vld [vmem:[#allocation10 + $0x320] ss:$8 sps:$4 sm:$0xff]  }
 0x36e   :  { %2215 = vmatpush1.bf16.msra.mxu0 %v3277_v5  ;;  %2246 = vmatprep.mubr.bf16.mxu0 %v1446_v8  ;;  %v3408_v63 = vpop.eup %3407  ;;  %v686_v5 = vsub.s32 6, %v3738_v18  ;;  %v3345_v18 = vld [vmem:[#allocation10 + $0x364] ss:$8 sps:$4 sm:$0xff]  }
 0x36f   :  { %2216 = vmatprep.subr.bf16.mxu0 %v3282_v7  ;;  %v1445_v0 = vpack.c.bf16 %v3408_v63, %v3408_v63  ;;  %v3336_v7 = vld [vmem:[#allocation10 + $0x334] ss:$8 sps:$4 sm:$0xff]  }
 0x370   :  { %v687_v8 = vrot.slane %v3771_v44, %v686_v5  ;;  %v3346_v44 = vld [vmem:[#allocation10 + $0x370] ss:$8 sps:$4 sm:$0xff]  }
 0x372   :  { %2217 = vmatpush1.bf16.msra.mxu0 %v3280_v11 }
 0x373   :  { %2218 = vmatprep.subr.bf16.mxu0 %v3285_v12  ;;  %v3337_v12 = vld [vmem:[#allocation10 + $0x340] ss:$8 sps:$4 sm:$0xff]  }
 0x376   :  { %2219 = vmatpush1.bf16.msra.mxu0 %v3283_v15  ;;  %v3348_v15 = vld [vmem:[#allocation10 + $0x374] ss:$8 sps:$4 sm:$0xff]  }
 0x377   :  { %2220 = vmatprep.subr.bf16.mxu0 %v3288_v16 }
 0x37a   :  { %2221 = vmatpush1.bf16.msra.mxu0 %v3286_v23  ;;  %v3391_v23 = vld [vmem:[#allocation11 + $0xe0] ss:$8 sps:$4 sm:$0xff]  }
 0x37b   :  { %v2918_v28 = vpop.f32.mrb[12].mxu1  ;;  %2222 = vmatprep.subr.bf16.mxu0 %v3291_v25  ;;  %2537 = vmatpush1.bf16.msra.mxu1 %v3391_v23  ;;  %v3396_v25 = vld [vmem:[#allocation11 + $0xf4] ss:$8 sps:$4 sm:$0xff]  }
 0x37c   :  { %v2919_v30 = vpop.f32.mrb[13].mxu1  ;;  %2538 = vmatprep.subr.bf16.mxu1 %v3396_v25 }
 0x37d   :  { %v3788_v32 = vadd.f32 %v2919_v30, %v2918_v28  ;;  %v2921_v22 = vpop.f32.mrb[14].mxu1  ;;  %v1565_v28 = vrot.slane %v1560_v27, %v3741_v19 }
 0x37e   :  { %v2922_v34 = vpop.f32.mrb[15].mxu1  ;;  %2223 = vmatpush1.bf16.msra.mxu0 %v3289_v29  ;;  %v1569_v29 = vrot.slane %v1560_v27, %v3747_v21 }
 0x37f   :  { %2224 = vmatprep.subr.bf16.mxu0 %v3294_v31  ;;  %v1429_v11 = vadd.f32 %v3788_v32, %v687_v8  ;;  %2539 = vmatpush1.bf16.msra.mxu1 %v3394_v26 }
 0x381   :  { %3409 = vtanh.f32 %v1429_v11 }
 0x382   :  { %2225 = vmatpush1.bf16.msra.mxu0 %v3292_v36 }
 0x383   :  { %2226 = vmatprep.subr.bf16.mxu0 %v3297_v37 }
 0x386   :  { %2227 = vmatpush1.bf16.msra.mxu0 %v3295_v39 }
 0x387   :  { %2228 = vmatprep.subr.bf16.mxu0 %v3300_v40 }
 0x38a   :  { %2229 = vmatpush1.bf16.msra.mxu0 %v3298_v41  ;;  %v2336_v41 = vld [vmem:[%s3825_s10] sm:$0x3] }
 0x38b   :  { %2230 = vmatprep.subr.bf16.mxu0 %v3303_v42  ;;  %v3410_v16 = vpop.eup %3409  ;;  %v2341_v42 = vrot.slane %v2336_v41, %v3741_v19 }
 0x38c   :  { %v1447_v17 = vpack.c.bf16 %v3410_v16, %v3410_v16 }
 0x38e   :  { %2231 = vmatpush1.bf16.msra.mxu0 %v3301_v43  ;;  %v2345_v43 = vrot.slane %v2336_v41, %v3747_v21 }
 0x38f   :  { %2232 = vmatprep.subr.bf16.mxu0 %v3306_v45  ;;  %v2555_v45 = vld [vmem:[%s3826_s11] sm:$0x3] }
 0x390   :  { %v2560_v52 = vrot.slane %v2555_v45, %v3741_v19  ;;  %v2564_v50 = vrot.slane %v2555_v45, %v3747_v21 }
 0x392   :  { %2233 = vmatpush1.bf16.msra.mxu0 %v3304_v46 }
 0x393   :  { %2234 = vmatprep.subr.bf16.mxu0 %v3309_v47 }
 0x396   :  { %2235 = vmatpush1.bf16.msra.mxu0 %v3307_v49 }
 0x397   :  { %2236 = vmatprep.subr.bf16.mxu0 %v3312_v51 }
 0x39a   :  { %2237 = vmatpush1.bf16.msra.mxu0 %v3310_v53 }
 0x39b   :  { %2238 = vmatprep.subr.bf16.mxu0 %v3315_v54 }
 0x39e   :  { %2239 = vmatpush1.bf16.msra.mxu0 %v3313_v55 }
 0x39f   :  { %2240 = vmatprep.subr.bf16.mxu0 %v3318_v56 }
 0x3a2   :  { %2241 = vmatpush1.bf16.msra.mxu0 %v3316_v57 }
 0x3a3   :  { %2242 = vmatprep.subr.bf16.mxu0 %v3321_v58 }
 0x3a6   :  { %2243 = vmatpush1.bf16.msra.mxu0 %v3319_v59 }
 0x3a7   :  { %2244 = vmatprep.subr.bf16.mxu0 %v3324_v60 }
 0x3aa   :  { %2245 = vmatpush1.bf16.msra.mxu0 %v3322_v61  ;;  %v2900_v61 = vld [vmem:[#allocation2] ss:$0 sm:$0xff] }
 0x3ab   :  { %2255 = vmatprep.subr.bf16.mxu0 %v3327_v62 }
 0x3ad   :  { %2247 = vmatmul.mubr.bf16.vlgmr.msra.gmra.mrb[8].mxu0 %v1445_v0 }
 0x3ae   :  { %2256 = vmatpush1.bf16.msra.mxu0 %v3325_v48  ;;  %2287 = vmatprep.mubr.bf16.mxu0 %v3565_v1  ;;  %v3342_v1 = vld [vmem:[#allocation10 + $0x354] ss:$8 sps:$4 sm:$0xff]  }
 0x3af   :  { %2257 = vmatprep.subr.bf16.mxu0 %v3330_v2 }
 0x3b2   :  { %2258 = vmatpush1.bf16.msra.mxu0 %v3328_v3 }
 0x3b3   :  { %2259 = vmatprep.subr.bf16.mxu0 %v3333_v4 }
 0x3b6   :  { %2260 = vmatpush1.bf16.msra.mxu0 %v3331_v6 }
 0x3b7   :  { %2261 = vmatprep.subr.bf16.mxu0 %v3336_v7 }
 0x3ba   :  { %2262 = vmatpush1.bf16.msra.mxu0 %v3334_v9 }
 0x3bb   :  { %2263 = vmatprep.subr.bf16.mxu0 %v3339_v10 }
 0x3be   :  { %2264 = vmatpush1.bf16.msra.mxu0 %v3337_v12 }
 0x3bf   :  { %2265 = vmatprep.subr.bf16.mxu0 %v3342_v1 }
 0x3c2   :  { %2266 = vmatpush1.bf16.msra.mxu0 %v3340_v13 }
 0x3c3   :  { %2267 = vmatprep.subr.bf16.mxu0 %v3345_v18 }
 0x3c6   :  { %2268 = vmatpush1.bf16.msra.mxu0 %v3343_v14 }
 0x3c7   :  { %2269 = vmatprep.subr.bf16.mxu0 %v3348_v15 }
 0x3ca   :  { %2270 = vmatpush1.bf16.msra.mxu0 %v3346_v44 }
 0x3cd   :  { %2288 = vmatmul.mubr.bf16.vlgmr.msra.gmra.mrb[8].mxu0 %v1447_v17 }
 0x4a0   :  { %v2289_v30 = vpop.f32.mrb[8].mxu0 }
 0x4a1   :  { %v2924_v31 = vadd.f32 %v2289_v30, %v1565_v28  ;;  %v2291_v32 = vpop.f32.mrb[9].mxu0 }
 0x4a2   :  { %v2925_v22 = vadd.f32 %v2291_v32, %v1569_v29  ;;  %v2293_v33 = vpop.f32.mrb[10].mxu0 }
 0x4a3   :  { %vm2296_vm0 = vcmp.gt.f32.partialorder %v2924_v31, 0.0  ;;  %v2298_v34 = vmul.f32 0.2, %v2924_v31  ;;  %v2294_v35 = vpop.f32.mrb[11].mxu0 }
 0x4a4   :  { %vm2297_vm1 = vcmp.gt.f32.partialorder %v2925_v22, 0.0  ;;  %v2299_v36 = vmul.f32 0.2, %v2925_v22 }
 0x4a5   :  { %v2300_v37 = vsel %vm2296_vm0, %v2924_v31, %v2298_v34 }
 0x4a6   :  { %v2301_v38 = vsel %vm2297_vm1, %v2925_v22, %v2299_v36  ;;  %v2302_v40 = vpack.c.bf16 %v2300_v37, %v2300_v37 }
 0x4a7   :  { %v2303_v39 = vpack.c.bf16 %v2301_v38, %v2301_v38 }
 0x4a9   :  { %2540 = vmatprep.mubr.bf16.mxu1 %v2303_v39 }
 0x4aa   :  { %2541 = vmatmul.mubr.bf16.vlgmr.msra.gmra.mrb[16].mxu1 %v2302_v40 }
 0x57d   :  { %v2542_v46 = vpop.f32.mrb[16].mxu1 }
 0x57e   :  { %v2543_v47 = vadd.f32 %v2542_v46, %v2341_v42  ;;  %v2544_v24 = vpop.f32.mrb[17].mxu1 }
 0x57f   :  { %v2545_v49 = vadd.f32 %v2544_v24, %v2345_v43  ;;  %v2546_v51 = vpop.f32.mrb[18].mxu1 }
 0x580   :  { %vm2549_vm2 = vcmp.gt.f32.partialorder %v2543_v47, 0.0  ;;  %v2551_v53 = vmul.f32 0.2, %v2543_v47  ;;  %v2547_v54 = vpop.f32.mrb[19].mxu1 }
 0x581   :  { %vm2550_vm3 = vcmp.gt.f32.partialorder %v2545_v49, 0.0  ;;  %v2552_v55 = vmul.f32 0.2, %v2545_v49 }
 0x582   :  { %v2553_v56 = vsel %vm2549_vm2, %v2543_v47, %v2551_v53 }
 0x583   :  { %v2554_v57 = vsel %vm2550_vm3, %v2545_v49, %v2552_v55  ;;  %v2567_v58 = vmul.f32 %v2560_v52, %v2553_v56 }
 0x584   :  { %v2568_v59 = vmul.f32 %v2564_v50, %v2554_v57 }
 0x586   :  { %v2569_v60 = vadd.f32 %v2568_v59, %v2567_v58 }
 0x588   :  { %2570 = vadd.xlane.f32.xlu0 %v2569_v60 }
 0x615   :  { %v2571_v62 = vpop.xlane.xlu0 %2570 }
 0x616   :  { %v2579_v63 = vadd.f32 %v2900_v61, %v2571_v62 }
 0x618   :  { %v2901_v48 = vmul.f32 -1.442695, %v2579_v63 }
 0x61a   :  { %3411 = vpow2.f32 %v2901_v48 }
 0x624   :  { %v3412_v0 = vpop.eup %3411 }
 0x625   :  { %v2583_v19 = vadd.f32 1.0, %v3412_v0 }
 0x627   :  { %3413 = vrcp.f32 %v2583_v19 }
 0x631   :  { %v3414_v2 = vpop.eup %3413 }
 0x632   :  { %2587 = vst.msk [vmem:[%s3828_s13] sm:$0xff] %vm2586_vm4, %v3414_v2 }
 0x633   :  { %2592 = vsyncpa [#allocation4], 1 }
 0x634   :  { %2593 = vsyncpa [#allocation6], 1 }
 0x635   :  { %2594 = vsyncpa [#allocation9], 1 }
 0x636   :  { %2595 = vsyncpa [#allocation12], 1 }

</bundles_post_ra>
